<compile_context>
chip_gen: v5e
topology: v5e:2x2
jax: 0.10.0
libtpu: 0.0.40
codegen_flags: <defaults>
</compile_context>

<pallas_src>
import math
import functools

import jax
import jax.numpy as jnp
from jax import lax
from jax.experimental import pallas as pl
from jax.experimental.pallas import tpu as pltpu


# ----------------------------- tiling helpers ------------------------------

_M_TILES = (512, 256, 128, 64, 32, 16, 8)   # row tiles (sublane-aligned)
_NK_TILES = (512, 256, 128)                 # lane / reduction tiles (MXU-wide)


def _pick_tile(dim, candidates, prefer_split=False):
    """Largest candidate that evenly divides `dim` (optionally preferring >=2
    blocks so a parallel axis can feed both v7x TensorCores); else the full
    dim (full-extent blocks always satisfy the (8,128) BlockSpec rule)."""
    if prefer_split:
        for c in candidates:
            if c <= dim and dim % c == 0 and dim // c >= 2:
                return c
    for c in candidates:
        if c <= dim and dim % c == 0:
            return c
    return dim


@functools.lru_cache(maxsize=None)
def _vmem_limit_bytes():
    # Generation-aware scoped-VMEM budget (v5e/v6e: 128 MiB phys, v7x: 64 MiB).
    try:
        cap = pltpu.get_tpu_info().vmem_capacity_bytes
    except Exception:
        cap = 64 * 1024 * 1024
    return int(min(cap * 3 // 4, 100 * 1024 * 1024))


def _compiler_params(sem):
    return pltpu.CompilerParams(dimension_semantics=sem,
                                vmem_limit_bytes=_vmem_limit_bytes())


# ------------------------- tiled linear (+ fused epilogues) -----------------

def _linear_kernel(x_ref, w_ref, b_ref, o_ref, acc_ref, *, activation):
    k = pl.program_id(2)

    @pl.when(k == 0)
    def _():
        acc_ref[...] = jnp.zeros_like(acc_ref)

    acc_ref[...] += jnp.dot(x_ref[...], w_ref[...],
                            preferred_element_type=jnp.float32)

    @pl.when(k == pl.num_programs(2) - 1)
    def _():
        y = acc_ref[...] + b_ref[...]
        if activation == "relu":
            y = jnp.maximum(y, 0.0)
        o_ref[...] = y.astype(o_ref.dtype)


def linear(x2d, w, b, activation=None, out_dtype=jnp.bfloat16):
    """x2d: (M, K) bf16 ; w: (K, N) bf16 ; b: (N,) f32 -> (M, N) out_dtype."""
    M, K = x2d.shape
    N = w.shape[1]
    # VMEM guard (v7x): never stream a huge non-tileable N as one weight block.
    n_pad = 0
    if _pick_tile(N, _NK_TILES) == N and N > max(_NK_TILES):
        n_pad = (-N) % 256
        w = jnp.pad(w, ((0, 0), (0, n_pad)))
        b = jnp.pad(b, (0, n_pad))
    Np = N + n_pad
    tm = _pick_tile(M, _M_TILES, prefer_split=True)
    tn = _pick_tile(Np, _NK_TILES)
    tk = _pick_tile(K, _NK_TILES)
    b2 = b.reshape(1, Np).astype(jnp.float32)
    out = pl.pallas_call(
        functools.partial(_linear_kernel, activation=activation),
        out_shape=jax.ShapeDtypeStruct((M, Np), out_dtype),
        grid=(M // tm, Np // tn, K // tk),
        in_specs=[
            pl.BlockSpec((tm, tk), lambda i, j, k: (i, k)),
            pl.BlockSpec((tk, tn), lambda i, j, k: (k, j)),
            pl.BlockSpec((1, tn), lambda i, j, k: (0, j)),
        ],
        out_specs=pl.BlockSpec((tm, tn), lambda i, j, k: (i, j)),
        scratch_shapes=[pltpu.VMEM((tm, tn), jnp.float32)],
        compiler_params=_compiler_params(("parallel", "parallel", "arbitrary")),
    )(x2d, w, b2)
    return out[:, :N] if n_pad else out


def _encoder_pe_kernel(x_ref, w_ref, b_ref, pe_ref, o_ref, acc_ref):
    k = pl.program_id(3)

    @pl.when(k == 0)
    def _():
        acc_ref[...] = jnp.zeros_like(acc_ref)

    acc_ref[...] += jnp.dot(x_ref[0], w_ref[...],
                            preferred_element_type=jnp.float32)

    @pl.when(k == pl.num_programs(3) - 1)
    def _():
        o_ref[0] = (acc_ref[...] + b_ref[...] + pe_ref[...]).astype(o_ref.dtype)


def encoder_with_pe(src, w, b, pe):
    """Token encoder with the positional-encoding add fused into the epilogue.
    src: (B, S, K) bf16 ; w: (K, D) bf16 ; pe: (S, D) f32 -> (B, S, D) bf16.
    4-D grid keeps the PE table indexed per sequence block (never replicated)."""
    B, S, K = src.shape
    D = w.shape[1]
    tm = _pick_tile(S, _M_TILES)
    tn = _pick_tile(D, _NK_TILES)
    tk = _pick_tile(K, _NK_TILES)
    b2 = b.reshape(1, D).astype(jnp.float32)
    return pl.pallas_call(
        _encoder_pe_kernel,
        out_shape=jax.ShapeDtypeStruct((B, S, D), jnp.bfloat16),
        grid=(B, S // tm, D // tn, K // tk),
        in_specs=[
            pl.BlockSpec((1, tm, tk), lambda bb, i, j, k: (bb, i, k)),
            pl.BlockSpec((tk, tn), lambda bb, i, j, k: (k, j)),
            pl.BlockSpec((1, tn), lambda bb, i, j, k: (0, j)),
            pl.BlockSpec((tm, tn), lambda bb, i, j, k: (i, j)),
        ],
        out_specs=pl.BlockSpec((1, tm, tn), lambda bb, i, j, k: (bb, i, j)),
        scratch_shapes=[pltpu.VMEM((tm, tn), jnp.float32)],
        compiler_params=_compiler_params(
            ("parallel", "parallel", "parallel", "arbitrary")),
    )(src, w, b2, pe.astype(jnp.float32))


def _linear_res_ln_kernel(x_ref, w_ref, b_ref, res_ref, g_ref, beta_ref,
                          o_ref, acc_ref, *, eps):
    k = pl.program_id(1)

    @pl.when(k == 0)
    def _():
        acc_ref[...] = jnp.zeros_like(acc_ref)

    acc_ref[...] += jnp.dot(x_ref[...], w_ref[...],
                            preferred_element_type=jnp.float32)

    @pl.when(k == pl.num_programs(1) - 1)
    def _():
        # LayerNorm(residual + x @ w + b) over the last dim, f32 statistics.
        y = acc_ref[...] + b_ref[...] + res_ref[...].astype(jnp.float32)
        mean = jnp.mean(y, axis=-1, keepdims=True)
        yc = y - mean
        var = jnp.mean(yc * yc, axis=-1, keepdims=True)
        inv = lax.rsqrt(var + eps)
        o_ref[...] = (yc * inv * g_ref[...] + beta_ref[...]).astype(o_ref.dtype)


def linear_residual_layernorm(x2d, w, b, residual, gamma, beta, eps=1e-5):
    """LayerNorm(residual + x2d @ w + b) -> (M, N) bf16.
    LN needs the full output dim, so the grid is (M-tiles, K-tiles); M is the
    only parallel axis so >=2 M-blocks are preferred (both v7x TCs busy)."""
    M, K = x2d.shape
    N = w.shape[1]
    tm = _pick_tile(M, _M_TILES, prefer_split=True)
    tk = _pick_tile(K, _NK_TILES)
    b2 = b.reshape(1, N).astype(jnp.float32)
    g2 = gamma.reshape(1, N).astype(jnp.float32)
    be2 = beta.reshape(1, N).astype(jnp.float32)
    return pl.pallas_call(
        functools.partial(_linear_res_ln_kernel, eps=eps),
        out_shape=jax.ShapeDtypeStruct((M, N), jnp.bfloat16),
        grid=(M // tm, K // tk),
        in_specs=[
            pl.BlockSpec((tm, tk), lambda i, k: (i, k)),
            pl.BlockSpec((tk, N), lambda i, k: (k, 0)),
            pl.BlockSpec((1, N), lambda i, k: (0, 0)),
            pl.BlockSpec((tm, N), lambda i, k: (i, 0)),
            pl.BlockSpec((1, N), lambda i, k: (0, 0)),
            pl.BlockSpec((1, N), lambda i, k: (0, 0)),
        ],
        out_specs=pl.BlockSpec((tm, N), lambda i, k: (i, 0)),
        scratch_shapes=[pltpu.VMEM((tm, N), jnp.float32)],
        compiler_params=_compiler_params(("parallel", "arbitrary")),
    )(x2d, w, b2, residual, g2, be2)


# --------------------- flash-style multi-head self-attention ----------------

def _flash_attn_kernel(q_ref, k_ref, v_ref, bias_ref, o_ref,
                       m_sc, l_sc, acc_sc, *, nhead):
    ki = pl.program_id(2)

    @pl.when(ki == 0)
    def _():
        m_sc[...] = jnp.full_like(m_sc, -jnp.inf)
        l_sc[...] = jnp.zeros_like(l_sc)
        acc_sc[...] = jnp.zeros_like(acc_sc)

    q = q_ref[0]          # (tq, D) bf16 — 1/sqrt(Dh) already folded into W_q
    k = k_ref[0]          # (tkv, D) bf16
    v = v_ref[0]          # (tkv, D) bf16
    bias = bias_ref[0]    # (1, tkv) f32 additive key-padding bias (per batch)
    D = q.shape[-1]
    Dh = D // nhead

    # Heads live in contiguous column blocks of the d_model slab; all heads of
    # a (batch, q-tile) are processed in one program (amortizes grid overhead,
    # keeps the output block lane-dense at d_model wide).
    for h in range(nhead):                        # static unroll
        cs = slice(h * Dh, (h + 1) * Dh)
        s = lax.dot_general(q[:, cs], k[:, cs], (((1,), (1,)), ((), ())),
                            preferred_element_type=jnp.float32)   # (tq, tkv)
        s = s + bias
        m_prev = m_sc[:, h:h + 1]
        m_new = jnp.maximum(m_prev, jnp.max(s, axis=-1, keepdims=True))
        alpha = jnp.exp(m_prev - m_new)
        p = jnp.exp(s - m_new)
        l_sc[:, h:h + 1] = alpha * l_sc[:, h:h + 1] + jnp.sum(p, axis=-1,
                                                              keepdims=True)
        acc_sc[:, cs] = alpha * acc_sc[:, cs] + jnp.dot(
            p.astype(v.dtype), v[:, cs], preferred_element_type=jnp.float32)
        m_sc[:, h:h + 1] = m_new

    @pl.when(ki == pl.num_programs(2) - 1)
    def _():
        inv = pl.reciprocal(l_sc[...], approx=True)          # (tq, nhead)
        parts = [acc_sc[:, h * Dh:(h + 1) * Dh] * inv[:, h:h + 1]
                 for h in range(nhead)]
        o_ref[0] = jnp.concatenate(parts, axis=-1).astype(o_ref.dtype)


def _attention_call(q_arr, k_arr, v_arr, bias, B, S, D, nhead, k_blk, v_blk):
    tq = _pick_tile(S, (256, 128, 64, 32, 16, 8))
    tkv = _pick_tile(S, (512, 256, 128, 64, 32, 16, 8))
    return pl.pallas_call(
        functools.partial(_flash_attn_kernel, nhead=nhead),
        out_shape=jax.ShapeDtypeStruct((B, S, D), jnp.bfloat16),
        grid=(B, S // tq, S // tkv),
        in_specs=[
            pl.BlockSpec((1, tq, D), lambda b, qi, ki: (b, qi, 0)),
            pl.BlockSpec((1, tkv, D), lambda b, qi, ki: (b, ki, k_blk)),
            pl.BlockSpec((1, tkv, D), lambda b, qi, ki: (b, ki, v_blk)),
            # one padding-bias row per batch, shared by all heads
            pl.BlockSpec((1, 1, tkv), lambda b, qi, ki: (b, 0, ki)),
        ],
        out_specs=pl.BlockSpec((1, tq, D), lambda b, qi, ki: (b, qi, 0)),
        scratch_shapes=[
            pltpu.VMEM((tq, nhead), jnp.float32),   # running max (per head)
            pltpu.VMEM((tq, nhead), jnp.float32),   # running denom (per head)
            pltpu.VMEM((tq, D), jnp.float32),       # running weighted values
        ],
        compiler_params=_compiler_params(("parallel", "parallel", "arbitrary")),
    )(q_arr, k_arr, v_arr, bias)


def multihead_attention(qkv, bias, B, S, d_model, nhead):
    """qkv: (B*S, 3*d_model) bf16 from the fused in-proj -> (B*S, d_model) bf16.
    No head transposes: heads stay contiguous in the feature dim throughout."""
    if d_model % 128 == 0:
        # zero-copy: index the Q/K/V column blocks of the packed slab directly
        qkv3 = qkv.reshape(B, S, 3 * d_model)
        o3 = _attention_call(qkv3, qkv3, qkv3, bias, B, S, d_model, nhead, 1, 2)
    else:
        qkv4 = qkv.reshape(B, S, 3, d_model)
        o3 = _attention_call(qkv4[:, :, 0], qkv4[:, :, 1], qkv4[:, :, 2],
                             bias, B, S, d_model, nhead, 0, 0)
    return o3.reshape(B * S, d_model)


# ----------------------------- parameter setup -----------------------------

def init_params(key, ntoken, d_model, nhead, d_hid, nlayers):
    initrange = 0.1
    Dh = d_model // nhead
    attn_scale = 1.0 / math.sqrt(Dh)

    def unif(k, shape, a):
        return jax.random.uniform(k, shape, jnp.float32, -a, a)

    def as_mxu(w_out_in):
        # pre-transpose once to (in, out) and cast for the bf16 MXU
        return w_out_in.T.astype(jnp.bfloat16)

    ks = jax.random.split(key, 2 + nlayers)
    params = {}
    ke = jax.random.split(ks[0], 2)
    params["enc_w"] = as_mxu(unif(ke[0], (d_model, ntoken), initrange))
    params["enc_b"] = unif(ke[1], (d_model,), 1.0 / math.sqrt(ntoken))
    params["dec_w"] = as_mxu(unif(ks[1], (ntoken, d_model), initrange))
    params["dec_b"] = jnp.zeros((ntoken,), jnp.float32)   # zeroed like init_weights()

    layers = []
    for l in range(nlayers):
        kl = jax.random.split(ks[2 + l], 8)
        sd = 1.0 / math.sqrt(d_model)
        sh = 1.0 / math.sqrt(d_hid)
        in_w = unif(kl[0], (3 * d_model, d_model), sd)     # torch layout [Q;K;V]
        in_b = unif(kl[1], (3 * d_model,), sd)
        # fold the 1/sqrt(Dh) attention scale into the Q projection (rows 0:d_model)
        in_w = in_w.at[:d_model].multiply(attn_scale)
        in_b = in_b.at[:d_model].multiply(attn_scale)
        layers.append({
            "in_proj_w":  as_mxu(in_w),
            "in_proj_b":  in_b,
            "out_proj_w": as_mxu(unif(kl[2], (d_model, d_model), sd)),
            "out_proj_b": unif(kl[3], (d_model,), sd),
            "ln1_g": jnp.ones((d_model,), jnp.float32),
            "ln1_b": jnp.zeros((d_model,), jnp.float32),
            "lin1_w": as_mxu(unif(kl[4], (d_hid, d_model), sd)),
            "lin1_b": unif(kl[5], (d_hid,), sd),
            "lin2_w": as_mxu(unif(kl[6], (d_model, d_hid), sh)),
            "lin2_b": unif(kl[7], (d_model,), sh),
            "ln2_g": jnp.ones((d_model,), jnp.float32),
            "ln2_b": jnp.zeros((d_model,), jnp.float32),
        })
    params["layers"] = layers
    return params


def make_pe(seqlen, d_model):
    # Matches the PositionalEncoding buffer (sin even cols, cos odd cols).
    position = jnp.arange(seqlen, dtype=jnp.float32)
    div_term = jnp.exp(jnp.arange(0, d_model, 2, dtype=jnp.float32)
                       * (-math.log(10000.0) / d_model))
    angles = jnp.outer(position, div_term)
    pe = jnp.zeros((seqlen, d_model), jnp.float32)
    pe = pe.at[:, 0::2].set(jnp.sin(angles)[:, :(d_model + 1) // 2])
    pe = pe.at[:, 1::2].set(jnp.cos(angles)[:, :d_model // 2])
    return pe


# ------------------------------- forward pass -------------------------------

def transformer_forward(params, src, src_mask, *, d_model, nhead):
    """src: (B, S, ntoken) float; src_mask: (B, S) bool key-padding mask
    (True = padding), matching `src_key_padding_mask` in the reference module.
    NOTE: this module does NOT scale the encoder output by sqrt(d_model)."""
    B, S, ntoken = src.shape

    # token encoder + positional encoding in one fused tiled matmul
    # (dropout = identity in eval)
    x3 = encoder_with_pe(src.astype(jnp.bfloat16), params["enc_w"],
                         params["enc_b"], make_pe(S, d_model))
    x2d = x3.reshape(B * S, d_model)                      # bf16 residual stream

    # key padding mask -> one additive bias row per batch: (B, 1, S).
    # Fully-padded rows attend uniformly over pads (finite) instead of NaN.
    bias = jnp.where(src_mask, -1e30, 0.0).astype(jnp.float32).reshape(B, 1, S)

    for lp in params["layers"]:
        # --- self attention block (post-norm TransformerEncoderLayer) ---
        qkv = linear(x2d, lp["in_proj_w"], lp["in_proj_b"])   # (B*S, 3*d_model) bf16
        o = multihead_attention(qkv, bias, B, S, d_model, nhead)
        # out_proj + residual add + LayerNorm fused in one kernel
        x2d = linear_residual_layernorm(o, lp["out_proj_w"], lp["out_proj_b"],
                                        x2d, lp["ln1_g"], lp["ln1_b"])

        # --- feed forward block (relu fused in lin1; residual+LN fused in lin2) ---
        h = linear(x2d, lp["lin1_w"], lp["lin1_b"], activation="relu")
        x2d = linear_residual_layernorm(h, lp["lin2_w"], lp["lin2_b"],
                                        x2d, lp["ln2_g"], lp["ln2_b"])

    # decoder: Linear(d_model -> ntoken); final logits kept in f32
    out2d = linear(x2d, params["dec_w"], params["dec_b"], out_dtype=jnp.float32)
    return out2d.reshape(B, S, ntoken)


# ----------------------------------- main -----------------------------------

if __name__ == "__main__":
    B, S = 2, 8
    ntoken, d_model, nhead, d_hid, nlayers = 16, 32, 2, 64, 2

    key = jax.random.PRNGKey(0)
    kp, kx = jax.random.split(key)
    params = init_params(kp, ntoken, d_model, nhead, d_hid, nlayers)

    src = jax.random.normal(kx, (B, S, ntoken), jnp.float32)
    lengths = jnp.array([S, S - 2])
    src_mask = jnp.arange(S)[None, :] >= lengths[:, None]   # (B, S) bool, True = pad

    fwd = jax.jit(functools.partial(transformer_forward, d_model=d_model, nhead=nhead))
    out = jax.block_until_ready(fwd(params, src, src_mask))

    assert out.shape == (B, S, ntoken)
    assert bool(jnp.all(jnp.isfinite(out)))
    print("KERNEL_OK")
</pallas_src>

<mosaic_0001>
module attributes {stable_mosaic.version = 11 : i64} {
  func.func @_encoder_pe_kernel(%arg0: i32, %arg1: i32, %arg2: i32, %arg3: i32, %arg4: memref<1x8x16xbf16, #tpu.memory_space<vmem>>, %arg5: memref<16x32xbf16, #tpu.memory_space<vmem>>, %arg6: memref<1x32xf32, #tpu.memory_space<vmem>>, %arg7: memref<8x32xf32, #tpu.memory_space<vmem>>, %arg8: memref<1x8x32xbf16, #tpu.memory_space<vmem>>, %arg9: memref<8x32xf32, #tpu.memory_space<vmem>>) attributes {dimension_semantics = [#tpu.dimension_semantics<parallel>, #tpu.dimension_semantics<parallel>, #tpu.dimension_semantics<parallel>, #tpu.dimension_semantics<arbitrary>], iteration_bounds = array<i64: 2, 1, 1, 1>, scalar_prefetch = 0 : i64, scratch_operands = 1 : i64, tpu.core_type = #tpu.core_type<tc>, window_params = [{transform_indices = @transform_0, window_bounds = array<i64: 1, 8, 16>}, {transform_indices = @transform_1, window_bounds = array<i64: 16, 32>}, {transform_indices = @transform_2, window_bounds = array<i64: 1, 32>}, {transform_indices = @transform_3, window_bounds = array<i64: 8, 32>}, {transform_indices = @transform_4, window_bounds = array<i64: 1, 8, 32>}]} {
    %c0_i32 = arith.constant 0 : i32
    %0 = arith.cmpi eq, %arg3, %c0_i32 : i32
    %1 = arith.extui %0 : i1 to i32
    %c0_i32_0 = arith.constant 0 : i32
    %2 = arith.cmpi ne, %1, %c0_i32_0 : i32
    scf.if %2 {
      %cst_11 = arith.constant 0.000000e+00 : f32
      %13 = vector.broadcast %cst_11 : f32 to vector<8x32xf32>
      %c0_12 = arith.constant 0 : index
      %c0_13 = arith.constant 0 : index
      %14 = vector.load %arg9[%c0_12, %c0_13] : memref<8x32xf32, #tpu.memory_space<vmem>>, vector<8x32xf32>
      tpu.vector_store %arg9[%c0_12, %c0_13], %13 {strides = array<i32>} : memref<8x32xf32, #tpu.memory_space<vmem>>, vector<8x32xf32>,
    } else {
    }
    %c0 = arith.constant 0 : index
    %c0_1 = arith.constant 0 : index
    %3 = vector.load %arg9[%c0, %c0_1] : memref<8x32xf32, #tpu.memory_space<vmem>>, vector<8x32xf32>
    %c0_2 = arith.constant 0 : index
    %c0_3 = arith.constant 0 : index
    %c0_4 = arith.constant 0 : index
    %4 = vector.load %arg4[%c0_2, %c0_3, %c0_4] : memref<1x8x16xbf16, #tpu.memory_space<vmem>>, vector<1x8x16xbf16>
    %5 = vector.shape_cast %4 : vector<1x8x16xbf16> to vector<8x16xbf16>
    %c0_5 = arith.constant 0 : index
    %c0_6 = arith.constant 0 : index
    %6 = vector.load %arg5[%c0_5, %c0_6] : memref<16x32xbf16, #tpu.memory_space<vmem>>, vector<16x32xbf16>
    %cst = arith.constant dense<0.000000e+00> : vector<8x32xf32>
    %7 = tpu.matmul %5, %6, %cst {dimension_numbers = #tpu.dot_dimension_numbers<[1], [0], [0], [1], [0, 0, 1, 1], [], []>} : vector<8x16xbf16>, vector<16x32xbf16>, vector<8x32xf32> -> vector<8x32xf32>
    %8 = arith.addf %3, %7 : vector<8x32xf32>
    %c0_7 = arith.constant 0 : index
    %c0_8 = arith.constant 0 : index
    %9 = vector.load %arg9[%c0_7, %c0_8] : memref<8x32xf32, #tpu.memory_space<vmem>>, vector<8x32xf32>
    tpu.vector_store %arg9[%c0_7, %c0_8], %8 {strides = array<i32>} : memref<8x32xf32, #tpu.memory_space<vmem>>, vector<8x32xf32>,
    %c0_i32_9 = arith.constant 0 : i32
    %10 = arith.cmpi eq, %arg3, %c0_i32_9 : i32
    %11 = arith.extui %10 : i1 to i32
    %c0_i32_10 = arith.constant 0 : i32
    %12 = arith.cmpi ne, %11, %c0_i32_10 : i32
    scf.if %12 {
      %c0_11 = arith.constant 0 : index
      %c0_12 = arith.constant 0 : index
      %13 = vector.load %arg9[%c0_11, %c0_12] : memref<8x32xf32, #tpu.memory_space<vmem>>, vector<8x32xf32>
      %c0_13 = arith.constant 0 : index
      %c0_14 = arith.constant 0 : index
      %14 = vector.load %arg6[%c0_13, %c0_14] : memref<1x32xf32, #tpu.memory_space<vmem>>, vector<1x32xf32>
      %15 = vector.broadcast %14 : vector<1x32xf32> to vector<8x32xf32>
      %16 = arith.addf %13, %15 : vector<8x32xf32>
      %c0_15 = arith.constant 0 : index
      %c0_16 = arith.constant 0 : index
      %17 = vector.load %arg7[%c0_15, %c0_16] : memref<8x32xf32, #tpu.memory_space<vmem>>, vector<8x32xf32>
      %18 = arith.addf %16, %17 : vector<8x32xf32>
      %19 = arith.truncf %18 : vector<8x32xf32> to vector<8x32xbf16>
      %c0_17 = arith.constant 0 : index
      %c0_18 = arith.constant 0 : index
      %c0_19 = arith.constant 0 : index
      %20 = vector.load %arg8[%c0_17, %c0_18, %c0_19] : memref<1x8x32xbf16, #tpu.memory_space<vmem>>, vector<1x8x32xbf16>
      %21 = vector.shape_cast %20 : vector<1x8x32xbf16> to vector<8x32xbf16>
      %22 = vector.shape_cast %19 : vector<8x32xbf16> to vector<1x8x32xbf16>
      tpu.vector_store %arg8[%c0_17, %c0_18, %c0_19], %22 {strides = array<i32>} : memref<1x8x32xbf16, #tpu.memory_space<vmem>>, vector<1x8x32xbf16>,
    } else {
    }
    return
  }
  func.func @transform_0(%arg0: i32, %arg1: i32, %arg2: i32, %arg3: i32) -> (i32, i32, i32) {
    %c0_i32 = arith.constant 0 : i32
    return %arg0, %arg1, %arg3 : i32, i32, i32
  }
  func.func @transform_1(%arg0: i32, %arg1: i32, %arg2: i32, %arg3: i32) -> (i32, i32) {
    %c0_i32 = arith.constant 0 : i32
    return %arg3, %arg2 : i32, i32
  }
  func.func @transform_2(%arg0: i32, %arg1: i32, %arg2: i32, %arg3: i32) -> (i32, i32) {
    %c0_i32 = arith.constant 0 : i32
    %c0_i32_0 = arith.constant 0 : i32
    return %c0_i32, %arg2 : i32, i32
  }
  func.func @transform_3(%arg0: i32, %arg1: i32, %arg2: i32, %arg3: i32) -> (i32, i32) {
    %c0_i32 = arith.constant 0 : i32
    return %arg1, %arg2 : i32, i32
  }
  func.func @transform_4(%arg0: i32, %arg1: i32, %arg2: i32, %arg3: i32) -> (i32, i32, i32) {
    %c0_i32 = arith.constant 0 : i32
    return %arg0, %arg1, %arg2 : i32, i32, i32
  }
}

module attributes {stable_mosaic.version = 11 : i64} {
  func.func @_linear_kernel(%arg0: i32, %arg1: i32, %arg2: i32, %arg3: memref<8x32xbf16, #tpu.memory_space<vmem>>, %arg4: memref<32x96xbf16, #tpu.memory_space<vmem>>, %arg5: memref<1x96xf32, #tpu.memory_space<vmem>>, %arg6: memref<8x96xbf16, #tpu.memory_space<vmem>>, %arg7: memref<8x96xf32, #tpu.memory_space<vmem>>) attributes {dimension_semantics = [#tpu.dimension_semantics<parallel>, #tpu.dimension_semantics<parallel>, #tpu.dimension_semantics<arbitrary>], iteration_bounds = array<i64: 2, 1, 1>, scalar_prefetch = 0 : i64, scratch_operands = 1 : i64, tpu.core_type = #tpu.core_type<tc>, window_params = [{transform_indices = @transform_0, window_bounds = array<i64: 8, 32>}, {transform_indices = @transform_1, window_bounds = array<i64: 32, 96>}, {transform_indices = @transform_2, window_bounds = array<i64: 1, 96>}, {transform_indices = @transform_3, window_bounds = array<i64: 8, 96>}]} {
    %c0_i32 = arith.constant 0 : i32
    %0 = arith.cmpi eq, %arg2, %c0_i32 : i32
    %1 = arith.extui %0 : i1 to i32
    %c0_i32_0 = arith.constant 0 : i32
    %2 = arith.cmpi ne, %1, %c0_i32_0 : i32
    scf.if %2 {
      %cst_10 = arith.constant 0.000000e+00 : f32
      %12 = vector.broadcast %cst_10 : f32 to vector<8x96xf32>
      %c0_11 = arith.constant 0 : index
      %c0_12 = arith.constant 0 : index
      %13 = vector.load %arg7[%c0_11, %c0_12] : memref<8x96xf32, #tpu.memory_space<vmem>>, vector<8x96xf32>
      tpu.vector_store %arg7[%c0_11, %c0_12], %12 {strides = array<i32>} : memref<8x96xf32, #tpu.memory_space<vmem>>, vector<8x96xf32>,
    } else {
    }
    %c0 = arith.constant 0 : index
    %c0_1 = arith.constant 0 : index
    %3 = vector.load %arg7[%c0, %c0_1] : memref<8x96xf32, #tpu.memory_space<vmem>>, vector<8x96xf32>
    %c0_2 = arith.constant 0 : index
    %c0_3 = arith.constant 0 : index
    %4 = vector.load %arg3[%c0_2, %c0_3] : memref<8x32xbf16, #tpu.memory_space<vmem>>, vector<8x32xbf16>
    %c0_4 = arith.constant 0 : index
    %c0_5 = arith.constant 0 : index
    %5 = vector.load %arg4[%c0_4, %c0_5] : memref<32x96xbf16, #tpu.memory_space<vmem>>, vector<32x96xbf16>
    %cst = arith.constant dense<0.000000e+00> : vector<8x96xf32>
    %6 = tpu.matmul %4, %5, %cst {dimension_numbers = #tpu.dot_dimension_numbers<[1], [0], [0], [1], [0, 0, 1, 1], [], []>} : vector<8x32xbf16>, vector<32x96xbf16>, vector<8x96xf32> -> vector<8x96xf32>
    %7 = arith.addf %3, %6 : vector<8x96xf32>
    %c0_6 = arith.constant 0 : index
    %c0_7 = arith.constant 0 : index
    %8 = vector.load %arg7[%c0_6, %c0_7] : memref<8x96xf32, #tpu.memory_space<vmem>>, vector<8x96xf32>
    tpu.vector_store %arg7[%c0_6, %c0_7], %7 {strides = array<i32>} : memref<8x96xf32, #tpu.memory_space<vmem>>, vector<8x96xf32>,
    %c0_i32_8 = arith.constant 0 : i32
    %9 = arith.cmpi eq, %arg2, %c0_i32_8 : i32
    %10 = arith.extui %9 : i1 to i32
    %c0_i32_9 = arith.constant 0 : i32
    %11 = arith.cmpi ne, %10, %c0_i32_9 : i32
    scf.if %11 {
      %c0_10 = arith.constant 0 : index
      %c0_11 = arith.constant 0 : index
      %12 = vector.load %arg7[%c0_10, %c0_11] : memref<8x96xf32, #tpu.memory_space<vmem>>, vector<8x96xf32>
      %c0_12 = arith.constant 0 : index
      %c0_13 = arith.constant 0 : index
      %13 = vector.load %arg5[%c0_12, %c0_13] : memref<1x96xf32, #tpu.memory_space<vmem>>, vector<1x96xf32>
      %14 = vector.broadcast %13 : vector<1x96xf32> to vector<8x96xf32>
      %15 = arith.addf %12, %14 : vector<8x96xf32>
      %16 = arith.truncf %15 : vector<8x96xf32> to vector<8x96xbf16>
      %c0_14 = arith.constant 0 : index
      %c0_15 = arith.constant 0 : index
      %17 = vector.load %arg6[%c0_14, %c0_15] : memref<8x96xbf16, #tpu.memory_space<vmem>>, vector<8x96xbf16>
      tpu.vector_store %arg6[%c0_14, %c0_15], %16 {strides = array<i32>} : memref<8x96xbf16, #tpu.memory_space<vmem>>, vector<8x96xbf16>,
    } else {
    }
    return
  }
  func.func @transform_0(%arg0: i32, %arg1: i32, %arg2: i32) -> (i32, i32) {
    %c0_i32 = arith.constant 0 : i32
    return %arg0, %arg2 : i32, i32
  }
  func.func @transform_1(%arg0: i32, %arg1: i32, %arg2: i32) -> (i32, i32) {
    %c0_i32 = arith.constant 0 : i32
    return %arg2, %arg1 : i32, i32
  }
  func.func @transform_2(%arg0: i32, %arg1: i32, %arg2: i32) -> (i32, i32) {
    %c0_i32 = arith.constant 0 : i32
    %c0_i32_0 = arith.constant 0 : i32
    return %c0_i32, %arg1 : i32, i32
  }
  func.func @transform_3(%arg0: i32, %arg1: i32, %arg2: i32) -> (i32, i32) {
    %c0_i32 = arith.constant 0 : i32
    return %arg0, %arg1 : i32, i32
  }
}

module attributes {stable_mosaic.version = 11 : i64} {
  func.func @_linear_res_ln_kernel(%arg0: i32, %arg1: i32, %arg2: memref<8x32xbf16, #tpu.memory_space<vmem>>, %arg3: memref<32x32xbf16, #tpu.memory_space<vmem>>, %arg4: memref<1x32xf32, #tpu.memory_space<vmem>>, %arg5: memref<8x32xbf16, #tpu.memory_space<vmem>>, %arg6: memref<1x32xf32, #tpu.memory_space<vmem>>, %arg7: memref<1x32xf32, #tpu.memory_space<vmem>>, %arg8: memref<8x32xbf16, #tpu.memory_space<vmem>>, %arg9: memref<8x32xf32, #tpu.memory_space<vmem>>) attributes {dimension_semantics = [#tpu.dimension_semantics<parallel>, #tpu.dimension_semantics<arbitrary>], iteration_bounds = array<i64: 2, 1>, scalar_prefetch = 0 : i64, scratch_operands = 1 : i64, tpu.core_type = #tpu.core_type<tc>, window_params = [{transform_indices = @transform_0, window_bounds = array<i64: 8, 32>}, {transform_indices = @transform_1, window_bounds = array<i64: 32, 32>}, {pipeline_mode = #tpu.pipeline_mode<synchronous>, transform_indices = @transform_2, window_bounds = array<i64: 1, 32>}, {transform_indices = @transform_3, window_bounds = array<i64: 8, 32>}, {pipeline_mode = #tpu.pipeline_mode<synchronous>, transform_indices = @transform_4, window_bounds = array<i64: 1, 32>}, {pipeline_mode = #tpu.pipeline_mode<synchronous>, transform_indices = @transform_5, window_bounds = array<i64: 1, 32>}, {transform_indices = @transform_6, window_bounds = array<i64: 8, 32>}]} {
    %c0_i32 = arith.constant 0 : i32
    %0 = arith.cmpi eq, %arg1, %c0_i32 : i32
    %1 = arith.extui %0 : i1 to i32
    %c0_i32_0 = arith.constant 0 : i32
    %2 = arith.cmpi ne, %1, %c0_i32_0 : i32
    scf.if %2 {
      %cst_10 = arith.constant 0.000000e+00 : f32
      %12 = vector.broadcast %cst_10 : f32 to vector<8x32xf32>
      %c0_11 = arith.constant 0 : index
      %c0_12 = arith.constant 0 : index
      %13 = vector.load %arg9[%c0_11, %c0_12] : memref<8x32xf32, #tpu.memory_space<vmem>>, vector<8x32xf32>
      tpu.vector_store %arg9[%c0_11, %c0_12], %12 {strides = array<i32>} : memref<8x32xf32, #tpu.memory_space<vmem>>, vector<8x32xf32>,
    } else {
    }
    %c0 = arith.constant 0 : index
    %c0_1 = arith.constant 0 : index
    %3 = vector.load %arg9[%c0, %c0_1] : memref<8x32xf32, #tpu.memory_space<vmem>>, vector<8x32xf32>
    %c0_2 = arith.constant 0 : index
    %c0_3 = arith.constant 0 : index
    %4 = vector.load %arg2[%c0_2, %c0_3] : memref<8x32xbf16, #tpu.memory_space<vmem>>, vector<8x32xbf16>
    %c0_4 = arith.constant 0 : index
    %c0_5 = arith.constant 0 : index
    %5 = vector.load %arg3[%c0_4, %c0_5] : memref<32x32xbf16, #tpu.memory_space<vmem>>, vector<32x32xbf16>
    %cst = arith.constant dense<0.000000e+00> : vector<8x32xf32>
    %6 = tpu.matmul %4, %5, %cst {dimension_numbers = #tpu.dot_dimension_numbers<[1], [0], [0], [1], [0, 0, 1, 1], [], []>} : vector<8x32xbf16>, vector<32x32xbf16>, vector<8x32xf32> -> vector<8x32xf32>
    %7 = arith.addf %3, %6 : vector<8x32xf32>
    %c0_6 = arith.constant 0 : index
    %c0_7 = arith.constant 0 : index
    %8 = vector.load %arg9[%c0_6, %c0_7] : memref<8x32xf32, #tpu.memory_space<vmem>>, vector<8x32xf32>
    tpu.vector_store %arg9[%c0_6, %c0_7], %7 {strides = array<i32>} : memref<8x32xf32, #tpu.memory_space<vmem>>, vector<8x32xf32>,
    %c0_i32_8 = arith.constant 0 : i32
    %9 = arith.cmpi eq, %arg1, %c0_i32_8 : i32
    %10 = arith.extui %9 : i1 to i32
    %c0_i32_9 = arith.constant 0 : i32
    %11 = arith.cmpi ne, %10, %c0_i32_9 : i32
    scf.if %11 {
      %c0_10 = arith.constant 0 : index
      %c0_11 = arith.constant 0 : index
      %12 = vector.load %arg9[%c0_10, %c0_11] : memref<8x32xf32, #tpu.memory_space<vmem>>, vector<8x32xf32>
      %c0_12 = arith.constant 0 : index
      %c0_13 = arith.constant 0 : index
      %13 = vector.load %arg4[%c0_12, %c0_13] : memref<1x32xf32, #tpu.memory_space<vmem>>, vector<1x32xf32>
      %14 = vector.broadcast %13 : vector<1x32xf32> to vector<8x32xf32>
      %15 = arith.addf %12, %14 : vector<8x32xf32>
      %c0_14 = arith.constant 0 : index
      %c0_15 = arith.constant 0 : index
      %16 = vector.load %arg5[%c0_14, %c0_15] : memref<8x32xbf16, #tpu.memory_space<vmem>>, vector<8x32xbf16>
      %17 = arith.extf %16 : vector<8x32xbf16> to vector<8x32xf32>
      %18 = arith.addf %15, %17 : vector<8x32xf32>
      %cst_16 = arith.constant dense<0.000000e+00> : vector<8xf32>
      %19 = vector.multi_reduction <add>, %18, %cst_16 [1] : vector<8x32xf32> to vector<8xf32>
      %20 = vector.shape_cast %19 : vector<8xf32> to vector<8x1xf32>
      %cst_17 = arith.constant 3.200000e+01 : f32
      %21 = vector.broadcast %cst_17 : f32 to vector<8x1xf32>
      %22 = arith.divf %20, %21 : vector<8x1xf32>
      %23 = vector.broadcast %22 : vector<8x1xf32> to vector<8x32xf32>
      %24 = arith.subf %18, %23 : vector<8x32xf32>
      %25 = arith.mulf %24, %24 : vector<8x32xf32>
      %cst_18 = arith.constant dense<0.000000e+00> : vector<8xf32>
      %26 = vector.multi_reduction <add>, %25, %cst_18 [1] : vector<8x32xf32> to vector<8xf32>
      %27 = vector.shape_cast %26 : vector<8xf32> to vector<8x1xf32>
      %cst_19 = arith.constant 3.200000e+01 : f32
      %28 = vector.broadcast %cst_19 : f32 to vector<8x1xf32>
      %29 = arith.divf %27, %28 : vector<8x1xf32>
      %cst_20 = arith.constant 9.99999974E-6 : f32
      %30 = vector.broadcast %cst_20 : f32 to vector<8x1xf32>
      %31 = arith.addf %29, %30 : vector<8x1xf32>
      %32 = math.rsqrt %31 : vector<8x1xf32>
      %33 = vector.broadcast %32 : vector<8x1xf32> to vector<8x32xf32>
      %34 = arith.mulf %24, %33 : vector<8x32xf32>
      %c0_21 = arith.constant 0 : index
      %c0_22 = arith.constant 0 : index
      %35 = vector.load %arg6[%c0_21, %c0_22] : memref<1x32xf32, #tpu.memory_space<vmem>>, vector<1x32xf32>
      %36 = vector.broadcast %35 : vector<1x32xf32> to vector<8x32xf32>
      %37 = arith.mulf %34, %36 : vector<8x32xf32>
      %c0_23 = arith.constant 0 : index
      %c0_24 = arith.constant 0 : index
      %38 = vector.load %arg7[%c0_23, %c0_24] : memref<1x32xf32, #tpu.memory_space<vmem>>, vector<1x32xf32>
      %39 = vector.broadcast %38 : vector<1x32xf32> to vector<8x32xf32>
      %40 = arith.addf %37, %39 : vector<8x32xf32>
      %41 = arith.truncf %40 : vector<8x32xf32> to vector<8x32xbf16>
      %c0_25 = arith.constant 0 : index
      %c0_26 = arith.constant 0 : index
      %42 = vector.load %arg8[%c0_25, %c0_26] : memref<8x32xbf16, #tpu.memory_space<vmem>>, vector<8x32xbf16>
      tpu.vector_store %arg8[%c0_25, %c0_26], %41 {strides = array<i32>} : memref<8x32xbf16, #tpu.memory_space<vmem>>, vector<8x32xbf16>,
    } else {
    }
    return
  }
  func.func @transform_0(%arg0: i32, %arg1: i32) -> (i32, i32) {
    %c0_i32 = arith.constant 0 : i32
    return %arg0, %arg1 : i32, i32
  }
  func.func @transform_1(%arg0: i32, %arg1: i32) -> (i32, i32) {
    %c0_i32 = arith.constant 0 : i32
    %c0_i32_0 = arith.constant 0 : i32
    return %arg1, %c0_i32 : i32, i32
  }
  func.func @transform_2(%arg0: i32, %arg1: i32) -> (i32, i32) {
    %c0_i32 = arith.constant 0 : i32
    %c0_i32_0 = arith.constant 0 : i32
    %c0_i32_1 = arith.constant 0 : i32
    return %c0_i32, %c0_i32_0 : i32, i32
  }
  func.func @transform_3(%arg0: i32, %arg1: i32) -> (i32, i32) {
    %c0_i32 = arith.constant 0 : i32
    %c0_i32_0 = arith.constant 0 : i32
    return %arg0, %c0_i32 : i32, i32
  }
  func.func @transform_4(%arg0: i32, %arg1: i32) -> (i32, i32) {
    %c0_i32 = arith.constant 0 : i32
    %c0_i32_0 = arith.constant 0 : i32
    %c0_i32_1 = arith.constant 0 : i32
    return %c0_i32, %c0_i32_0 : i32, i32
  }
  func.func @transform_5(%arg0: i32, %arg1: i32) -> (i32, i32) {
    %c0_i32 = arith.constant 0 : i32
    %c0_i32_0 = arith.constant 0 : i32
    %c0_i32_1 = arith.constant 0 : i32
    return %c0_i32, %c0_i32_0 : i32, i32
  }
  func.func @transform_6(%arg0: i32, %arg1: i32) -> (i32, i32) {
    %c0_i32 = arith.constant 0 : i32
    %c0_i32_0 = arith.constant 0 : i32
    return %arg0, %c0_i32 : i32, i32
  }
}

module attributes {stable_mosaic.version = 11 : i64} {
  func.func @_flash_attn_kernel(%arg0: i32, %arg1: i32, %arg2: i32, %arg3: memref<1x8x32xbf16, #tpu.memory_space<vmem>>, %arg4: memref<1x8x32xbf16, #tpu.memory_space<vmem>>, %arg5: memref<1x8x32xbf16, #tpu.memory_space<vmem>>, %arg6: memref<1x1x8xf32, #tpu.memory_space<vmem>>, %arg7: memref<1x8x32xbf16, #tpu.memory_space<vmem>>, %arg8: memref<8x2xf32, #tpu.memory_space<vmem>>, %arg9: memref<8x2xf32, #tpu.memory_space<vmem>>, %arg10: memref<8x32xf32, #tpu.memory_space<vmem>>) attributes {dimension_semantics = [#tpu.dimension_semantics<parallel>, #tpu.dimension_semantics<parallel>, #tpu.dimension_semantics<arbitrary>], iteration_bounds = array<i64: 2, 1, 1>, scalar_prefetch = 0 : i64, scratch_operands = 3 : i64, tpu.core_type = #tpu.core_type<tc>, window_params = [{transform_indices = @transform_0, window_bounds = array<i64: 1, 8, 32>}, {transform_indices = @transform_1, window_bounds = array<i64: 1, 8, 32>}, {transform_indices = @transform_2, window_bounds = array<i64: 1, 8, 32>}, {transform_indices = @transform_3, window_bounds = array<i64: 1, 1, 8>}, {transform_indices = @transform_4, window_bounds = array<i64: 1, 8, 32>}]} {
    %c0_i32 = arith.constant 0 : i32
    %0 = arith.cmpi eq, %arg2, %c0_i32 : i32
    %1 = arith.extui %0 : i1 to i32
    %c0_i32_0 = arith.constant 0 : i32
    %2 = arith.cmpi ne, %1, %c0_i32_0 : i32
    scf.if %2 {
      %cst_43 = arith.constant 0xFF800000 : f32
      %72 = vector.broadcast %cst_43 : f32 to vector<8x2xf32>
      %c0_44 = arith.constant 0 : index
      %c0_45 = arith.constant 0 : index
      %73 = vector.load %arg8[%c0_44, %c0_45] : memref<8x2xf32, #tpu.memory_space<vmem>>, vector<8x2xf32>
      tpu.vector_store %arg8[%c0_44, %c0_45], %72 {strides = array<i32>} : memref<8x2xf32, #tpu.memory_space<vmem>>, vector<8x2xf32>,
      %cst_46 = arith.constant 0.000000e+00 : f32
      %74 = vector.broadcast %cst_46 : f32 to vector<8x2xf32>
      %c0_47 = arith.constant 0 : index
      %c0_48 = arith.constant 0 : index
      %75 = vector.load %arg9[%c0_47, %c0_48] : memref<8x2xf32, #tpu.memory_space<vmem>>, vector<8x2xf32>
      tpu.vector_store %arg9[%c0_47, %c0_48], %74 {strides = array<i32>} : memref<8x2xf32, #tpu.memory_space<vmem>>, vector<8x2xf32>,
      %cst_49 = arith.constant 0.000000e+00 : f32
      %76 = vector.broadcast %cst_49 : f32 to vector<8x32xf32>
      %c0_50 = arith.constant 0 : index
      %c0_51 = arith.constant 0 : index
      %77 = vector.load %arg10[%c0_50, %c0_51] : memref<8x32xf32, #tpu.memory_space<vmem>>, vector<8x32xf32>
      tpu.vector_store %arg10[%c0_50, %c0_51], %76 {strides = array<i32>} : memref<8x32xf32, #tpu.memory_space<vmem>>, vector<8x32xf32>,
    } else {
    }
    %c0 = arith.constant 0 : index
    %c0_1 = arith.constant 0 : index
    %c0_2 = arith.constant 0 : index
    %3 = vector.load %arg3[%c0, %c0_1, %c0_2] : memref<1x8x32xbf16, #tpu.memory_space<vmem>>, vector<1x8x32xbf16>
    %4 = vector.shape_cast %3 : vector<1x8x32xbf16> to vector<8x32xbf16>
    %c0_3 = arith.constant 0 : index
    %c0_4 = arith.constant 0 : index
    %c0_5 = arith.constant 0 : index
    %5 = vector.load %arg4[%c0_3, %c0_4, %c0_5] : memref<1x8x32xbf16, #tpu.memory_space<vmem>>, vector<1x8x32xbf16>
    %6 = vector.shape_cast %5 : vector<1x8x32xbf16> to vector<8x32xbf16>
    %c0_6 = arith.constant 0 : index
    %c0_7 = arith.constant 0 : index
    %c0_8 = arith.constant 0 : index
    %7 = vector.load %arg5[%c0_6, %c0_7, %c0_8] : memref<1x8x32xbf16, #tpu.memory_space<vmem>>, vector<1x8x32xbf16>
    %8 = vector.shape_cast %7 : vector<1x8x32xbf16> to vector<8x32xbf16>
    %c0_9 = arith.constant 0 : index
    %c0_10 = arith.constant 0 : index
    %c0_11 = arith.constant 0 : index
    %9 = vector.load %arg6[%c0_9, %c0_10, %c0_11] : memref<1x1x8xf32, #tpu.memory_space<vmem>>, vector<1x1x8xf32>
    %10 = vector.shape_cast %9 : vector<1x1x8xf32> to vector<1x8xf32>
    %11 = vector.extract_strided_slice %4 {offsets = [0, 0], sizes = [8, 16], strides = [1, 1]} : vector<8x32xbf16> to vector<8x16xbf16>
    %12 = vector.extract_strided_slice %6 {offsets = [0, 0], sizes = [8, 16], strides = [1, 1]} : vector<8x32xbf16> to vector<8x16xbf16>
    %cst = arith.constant dense<0.000000e+00> : vector<8x8xf32>
    %13 = tpu.matmul %11, %12, %cst {dimension_numbers = #tpu.dot_dimension_numbers<[1], [1], [0], [0], [0, 0, 1, 0], [], []>} : vector<8x16xbf16>, vector<8x16xbf16>, vector<8x8xf32> -> vector<8x8xf32>
    %14 = vector.broadcast %10 : vector<1x8xf32> to vector<8x8xf32>
    %15 = arith.addf %13, %14 : vector<8x8xf32>
    %c0_12 = arith.constant 0 : index
    %c0_13 = arith.constant 0 : index
    %16 = vector.load %arg8[%c0_12, %c0_13] : memref<8x2xf32, #tpu.memory_space<vmem>>, vector<8x1xf32>
    %cst_14 = arith.constant dense<0xFF800000> : vector<8xf32>
    %17 = vector.multi_reduction <maximumf>, %15, %cst_14 [1] : vector<8x8xf32> to vector<8xf32>
    %18 = vector.shape_cast %17 : vector<8xf32> to vector<8x1xf32>
    %19 = arith.maximumf %16, %18 : vector<8x1xf32>
    %20 = arith.subf %16, %19 : vector<8x1xf32>
    %21 = math.exp %20 : vector<8x1xf32>
    %22 = vector.broadcast %19 : vector<8x1xf32> to vector<8x8xf32>
    %23 = arith.subf %15, %22 : vector<8x8xf32>
    %24 = math.exp %23 : vector<8x8xf32>
    %c0_15 = arith.constant 0 : index
    %c0_16 = arith.constant 0 : index
    %25 = vector.load %arg9[%c0_15, %c0_16] : memref<8x2xf32, #tpu.memory_space<vmem>>, vector<8x1xf32>
    %26 = arith.mulf %21, %25 : vector<8x1xf32>
    %cst_17 = arith.constant dense<0.000000e+00> : vector<8xf32>
    %27 = vector.multi_reduction <add>, %24, %cst_17 [1] : vector<8x8xf32> to vector<8xf32>
    %28 = vector.shape_cast %27 : vector<8xf32> to vector<8x1xf32>
    %29 = arith.addf %26, %28 : vector<8x1xf32>
    %c0_18 = arith.constant 0 : index
    %c0_19 = arith.constant 0 : index
    %30 = vector.load %arg9[%c0_18, %c0_19] : memref<8x2xf32, #tpu.memory_space<vmem>>, vector<8x1xf32>
    tpu.vector_store %arg9[%c0_18, %c0_19], %29 {strides = array<i32>} : memref<8x2xf32, #tpu.memory_space<vmem>>, vector<8x1xf32>,
    %c0_20 = arith.constant 0 : index
    %c0_21 = arith.constant 0 : index
    %31 = vector.load %arg10[%c0_20, %c0_21] : memref<8x32xf32, #tpu.memory_space<vmem>>, vector<8x16xf32>
    %32 = vector.broadcast %21 : vector<8x1xf32> to vector<8x16xf32>
    %33 = arith.mulf %32, %31 : vector<8x16xf32>
    %34 = arith.truncf %24 : vector<8x8xf32> to vector<8x8xbf16>
    %35 = vector.extract_strided_slice %8 {offsets = [0, 0], sizes = [8, 16], strides = [1, 1]} : vector<8x32xbf16> to vector<8x16xbf16>
    %cst_22 = arith.constant dense<0.000000e+00> : vector<8x16xf32>
    %36 = tpu.matmul %34, %35, %cst_22 {dimension_numbers = #tpu.dot_dimension_numbers<[1], [0], [0], [1], [0, 0, 1, 1], [], []>} : vector<8x8xbf16>, vector<8x16xbf16>, vector<8x16xf32> -> vector<8x16xf32>
    %37 = arith.addf %33, %36 : vector<8x16xf32>
    %c0_23 = arith.constant 0 : index
    %c0_24 = arith.constant 0 : index
    %38 = vector.load %arg10[%c0_23, %c0_24] : memref<8x32xf32, #tpu.memory_space<vmem>>, vector<8x16xf32>
    tpu.vector_store %arg10[%c0_23, %c0_24], %37 {strides = array<i32>} : memref<8x32xf32, #tpu.memory_space<vmem>>, vector<8x16xf32>,
    %c0_25 = arith.constant 0 : index
    %c0_26 = arith.constant 0 : index
    %39 = vector.load %arg8[%c0_25, %c0_26] : memref<8x2xf32, #tpu.memory_space<vmem>>, vector<8x1xf32>
    tpu.vector_store %arg8[%c0_25, %c0_26], %19 {strides = array<i32>} : memref<8x2xf32, #tpu.memory_space<vmem>>, vector<8x1xf32>,
    %40 = vector.extract_strided_slice %4 {offsets = [0, 16], sizes = [8, 16], strides = [1, 1]} : vector<8x32xbf16> to vector<8x16xbf16>
    %41 = vector.extract_strided_slice %6 {offsets = [0, 16], sizes = [8, 16], strides = [1, 1]} : vector<8x32xbf16> to vector<8x16xbf16>
    %cst_27 = arith.constant dense<0.000000e+00> : vector<8x8xf32>
    %42 = tpu.matmul %40, %41, %cst_27 {dimension_numbers = #tpu.dot_dimension_numbers<[1], [1], [0], [0], [0, 0, 1, 0], [], []>} : vector<8x16xbf16>, vector<8x16xbf16>, vector<8x8xf32> -> vector<8x8xf32>
    %43 = vector.broadcast %10 : vector<1x8xf32> to vector<8x8xf32>
    %44 = arith.addf %42, %43 : vector<8x8xf32>
    %c0_28 = arith.constant 0 : index
    %c1 = arith.constant 1 : index
    %45 = vector.load %arg8[%c0_28, %c1] : memref<8x2xf32, #tpu.memory_space<vmem>>, vector<8x1xf32>
    %cst_29 = arith.constant dense<0xFF800000> : vector<8xf32>
    %46 = vector.multi_reduction <maximumf>, %44, %cst_29 [1] : vector<8x8xf32> to vector<8xf32>
    %47 = vector.shape_cast %46 : vector<8xf32> to vector<8x1xf32>
    %48 = arith.maximumf %45, %47 : vector<8x1xf32>
    %49 = arith.subf %45, %48 : vector<8x1xf32>
    %50 = math.exp %49 : vector<8x1xf32>
    %51 = vector.broadcast %48 : vector<8x1xf32> to vector<8x8xf32>
    %52 = arith.subf %44, %51 : vector<8x8xf32>
    %53 = math.exp %52 : vector<8x8xf32>
    %c0_30 = arith.constant 0 : index
    %c1_31 = arith.constant 1 : index
    %54 = vector.load %arg9[%c0_30, %c1_31] : memref<8x2xf32, #tpu.memory_space<vmem>>, vector<8x1xf32>
    %55 = arith.mulf %50, %54 : vector<8x1xf32>
    %cst_32 = arith.constant dense<0.000000e+00> : vector<8xf32>
    %56 = vector.multi_reduction <add>, %53, %cst_32 [1] : vector<8x8xf32> to vector<8xf32>
    %57 = vector.shape_cast %56 : vector<8xf32> to vector<8x1xf32>
    %58 = arith.addf %55, %57 : vector<8x1xf32>
    %c0_33 = arith.constant 0 : index
    %c1_34 = arith.constant 1 : index
    %59 = vector.load %arg9[%c0_33, %c1_34] : memref<8x2xf32, #tpu.memory_space<vmem>>, vector<8x1xf32>
    tpu.vector_store %arg9[%c0_33, %c1_34], %58 {strides = array<i32>} : memref<8x2xf32, #tpu.memory_space<vmem>>, vector<8x1xf32>,
    %c0_35 = arith.constant 0 : index
    %c16 = arith.constant 16 : index
    %60 = vector.load %arg10[%c0_35, %c16] : memref<8x32xf32, #tpu.memory_space<vmem>>, vector<8x16xf32>
    %61 = vector.broadcast %50 : vector<8x1xf32> to vector<8x16xf32>
    %62 = arith.mulf %61, %60 : vector<8x16xf32>
    %63 = arith.truncf %53 : vector<8x8xf32> to vector<8x8xbf16>
    %64 = vector.extract_strided_slice %8 {offsets = [0, 16], sizes = [8, 16], strides = [1, 1]} : vector<8x32xbf16> to vector<8x16xbf16>
    %cst_36 = arith.constant dense<0.000000e+00> : vector<8x16xf32>
    %65 = tpu.matmul %63, %64, %cst_36 {dimension_numbers = #tpu.dot_dimension_numbers<[1], [0], [0], [1], [0, 0, 1, 1], [], []>} : vector<8x8xbf16>, vector<8x16xbf16>, vector<8x16xf32> -> vector<8x16xf32>
    %66 = arith.addf %62, %65 : vector<8x16xf32>
    %c0_37 = arith.constant 0 : index
    %c16_38 = arith.constant 16 : index
    %67 = vector.load %arg10[%c0_37, %c16_38] : memref<8x32xf32, #tpu.memory_space<vmem>>, vector<8x16xf32>
    tpu.vector_store %arg10[%c0_37, %c16_38], %66 {strides = array<i32>} : memref<8x32xf32, #tpu.memory_space<vmem>>, vector<8x16xf32>,
    %c0_39 = arith.constant 0 : index
    %c1_40 = arith.constant 1 : index
    %68 = vector.load %arg8[%c0_39, %c1_40] : memref<8x2xf32, #tpu.memory_space<vmem>>, vector<8x1xf32>
    tpu.vector_store %arg8[%c0_39, %c1_40], %48 {strides = array<i32>} : memref<8x2xf32, #tpu.memory_space<vmem>>, vector<8x1xf32>,
    %c0_i32_41 = arith.constant 0 : i32
    %69 = arith.cmpi eq, %arg2, %c0_i32_41 : i32
    %70 = arith.extui %69 : i1 to i32
    %c0_i32_42 = arith.constant 0 : i32
    %71 = arith.cmpi ne, %70, %c0_i32_42 : i32
    scf.if %71 {
      %c0_43 = arith.constant 0 : index
      %c0_44 = arith.constant 0 : index
      %72 = vector.load %arg9[%c0_43, %c0_44] : memref<8x2xf32, #tpu.memory_space<vmem>>, vector<8x2xf32>
      %73 = tpu.reciprocal %72 {approx = true} : vector<8x2xf32> -> vector<8x2xf32>
      %c0_45 = arith.constant 0 : index
      %c0_46 = arith.constant 0 : index
      %74 = vector.load %arg10[%c0_45, %c0_46] : memref<8x32xf32, #tpu.memory_space<vmem>>, vector<8x16xf32>
      %75 = vector.extract_strided_slice %73 {offsets = [0, 0], sizes = [8, 1], strides = [1, 1]} : vector<8x2xf32> to vector<8x1xf32>
      %76 = vector.broadcast %75 : vector<8x1xf32> to vector<8x16xf32>
      %77 = arith.mulf %74, %76 : vector<8x16xf32>
      %c0_47 = arith.constant 0 : index
      %c16_48 = arith.constant 16 : index
      %78 = vector.load %arg10[%c0_47, %c16_48] : memref<8x32xf32, #tpu.memory_space<vmem>>, vector<8x16xf32>
      %79 = vector.extract_strided_slice %73 {offsets = [0, 1], sizes = [8, 1], strides = [1, 1]} : vector<8x2xf32> to vector<8x1xf32>
      %80 = vector.broadcast %79 : vector<8x1xf32> to vector<8x16xf32>
      %81 = arith.mulf %78, %80 : vector<8x16xf32>
      %82 = tpu.concatenate %77, %81 in 1 : vector<8x16xf32>, vector<8x16xf32> -> vector<8x32xf32>
      %83 = arith.truncf %82 : vector<8x32xf32> to vector<8x32xbf16>
      %c0_49 = arith.constant 0 : index
      %c0_50 = arith.constant 0 : index
      %c0_51 = arith.constant 0 : index
      %84 = vector.load %arg7[%c0_49, %c0_50, %c0_51] : memref<1x8x32xbf16, #tpu.memory_space<vmem>>, vector<1x8x32xbf16>
      %85 = vector.shape_cast %84 : vector<1x8x32xbf16> to vector<8x32xbf16>
      %86 = vector.shape_cast %83 : vector<8x32xbf16> to vector<1x8x32xbf16>
      tpu.vector_store %arg7[%c0_49, %c0_50, %c0_51], %86 {strides = array<i32>} : memref<1x8x32xbf16, #tpu.memory_space<vmem>>, vector<1x8x32xbf16>,
    } else {
    }
    return
  }
  func.func @transform_0(%arg0: i32, %arg1: i32, %arg2: i32) -> (i32, i32, i32) {
    %c0_i32 = arith.constant 0 : i32
    %c0_i32_0 = arith.constant 0 : i32
    return %arg0, %arg1, %c0_i32 : i32, i32, i32
  }
  func.func @transform_1(%arg0: i32, %arg1: i32, %arg2: i32) -> (i32, i32, i32) {
    %c0_i32 = arith.constant 0 : i32
    %c0_i32_0 = arith.constant 0 : i32
    return %arg0, %arg2, %c0_i32 : i32, i32, i32
  }
  func.func @transform_2(%arg0: i32, %arg1: i32, %arg2: i32) -> (i32, i32, i32) {
    %c0_i32 = arith.constant 0 : i32
    %c0_i32_0 = arith.constant 0 : i32
    return %arg0, %arg2, %c0_i32 : i32, i32, i32
  }
  func.func @transform_3(%arg0: i32, %arg1: i32, %arg2: i32) -> (i32, i32, i32) {
    %c0_i32 = arith.constant 0 : i32
    %c0_i32_0 = arith.constant 0 : i32
    return %arg0, %c0_i32, %arg2 : i32, i32, i32
  }
  func.func @transform_4(%arg0: i32, %arg1: i32, %arg2: i32) -> (i32, i32, i32) {
    %c0_i32 = arith.constant 0 : i32
    %c0_i32_0 = arith.constant 0 : i32
    return %arg0, %arg1, %c0_i32 : i32, i32, i32
  }
}

module attributes {stable_mosaic.version = 11 : i64} {
  func.func @_linear_res_ln_kernel(%arg0: i32, %arg1: i32, %arg2: memref<8x64xbf16, #tpu.memory_space<vmem>>, %arg3: memref<64x32xbf16, #tpu.memory_space<vmem>>, %arg4: memref<1x32xf32, #tpu.memory_space<vmem>>, %arg5: memref<8x32xbf16, #tpu.memory_space<vmem>>, %arg6: memref<1x32xf32, #tpu.memory_space<vmem>>, %arg7: memref<1x32xf32, #tpu.memory_space<vmem>>, %arg8: memref<8x32xbf16, #tpu.memory_space<vmem>>, %arg9: memref<8x32xf32, #tpu.memory_space<vmem>>) attributes {dimension_semantics = [#tpu.dimension_semantics<parallel>, #tpu.dimension_semantics<arbitrary>], iteration_bounds = array<i64: 2, 1>, scalar_prefetch = 0 : i64, scratch_operands = 1 : i64, tpu.core_type = #tpu.core_type<tc>, window_params = [{transform_indices = @transform_0, window_bounds = array<i64: 8, 64>}, {transform_indices = @transform_1, window_bounds = array<i64: 64, 32>}, {pipeline_mode = #tpu.pipeline_mode<synchronous>, transform_indices = @transform_2, window_bounds = array<i64: 1, 32>}, {transform_indices = @transform_3, window_bounds = array<i64: 8, 32>}, {pipeline_mode = #tpu.pipeline_mode<synchronous>, transform_indices = @transform_4, window_bounds = array<i64: 1, 32>}, {pipeline_mode = #tpu.pipeline_mode<synchronous>, transform_indices = @transform_5, window_bounds = array<i64: 1, 32>}, {transform_indices = @transform_6, window_bounds = array<i64: 8, 32>}]} {
    %c0_i32 = arith.constant 0 : i32
    %0 = arith.cmpi eq, %arg1, %c0_i32 : i32
    %1 = arith.extui %0 : i1 to i32
    %c0_i32_0 = arith.constant 0 : i32
    %2 = arith.cmpi ne, %1, %c0_i32_0 : i32
    scf.if %2 {
      %cst_10 = arith.constant 0.000000e+00 : f32
      %12 = vector.broadcast %cst_10 : f32 to vector<8x32xf32>
      %c0_11 = arith.constant 0 : index
      %c0_12 = arith.constant 0 : index
      %13 = vector.load %arg9[%c0_11, %c0_12] : memref<8x32xf32, #tpu.memory_space<vmem>>, vector<8x32xf32>
      tpu.vector_store %arg9[%c0_11, %c0_12], %12 {strides = array<i32>} : memref<8x32xf32, #tpu.memory_space<vmem>>, vector<8x32xf32>,
    } else {
    }
    %c0 = arith.constant 0 : index
    %c0_1 = arith.constant 0 : index
    %3 = vector.load %arg9[%c0, %c0_1] : memref<8x32xf32, #tpu.memory_space<vmem>>, vector<8x32xf32>
    %c0_2 = arith.constant 0 : index
    %c0_3 = arith.constant 0 : index
    %4 = vector.load %arg2[%c0_2, %c0_3] : memref<8x64xbf16, #tpu.memory_space<vmem>>, vector<8x64xbf16>
    %c0_4 = arith.constant 0 : index
    %c0_5 = arith.constant 0 : index
    %5 = vector.load %arg3[%c0_4, %c0_5] : memref<64x32xbf16, #tpu.memory_space<vmem>>, vector<64x32xbf16>
    %cst = arith.constant dense<0.000000e+00> : vector<8x32xf32>
    %6 = tpu.matmul %4, %5, %cst {dimension_numbers = #tpu.dot_dimension_numbers<[1], [0], [0], [1], [0, 0, 1, 1], [], []>} : vector<8x64xbf16>, vector<64x32xbf16>, vector<8x32xf32> -> vector<8x32xf32>
    %7 = arith.addf %3, %6 : vector<8x32xf32>
    %c0_6 = arith.constant 0 : index
    %c0_7 = arith.constant 0 : index
    %8 = vector.load %arg9[%c0_6, %c0_7] : memref<8x32xf32, #tpu.memory_space<vmem>>, vector<8x32xf32>
    tpu.vector_store %arg9[%c0_6, %c0_7], %7 {strides = array<i32>} : memref<8x32xf32, #tpu.memory_space<vmem>>, vector<8x32xf32>,
    %c0_i32_8 = arith.constant 0 : i32
    %9 = arith.cmpi eq, %arg1, %c0_i32_8 : i32
    %10 = arith.extui %9 : i1 to i32
    %c0_i32_9 = arith.constant 0 : i32
    %11 = arith.cmpi ne, %10, %c0_i32_9 : i32
    scf.if %11 {
      %c0_10 = arith.constant 0 : index
      %c0_11 = arith.constant 0 : index
      %12 = vector.load %arg9[%c0_10, %c0_11] : memref<8x32xf32, #tpu.memory_space<vmem>>, vector<8x32xf32>
      %c0_12 = arith.constant 0 : index
      %c0_13 = arith.constant 0 : index
      %13 = vector.load %arg4[%c0_12, %c0_13] : memref<1x32xf32, #tpu.memory_space<vmem>>, vector<1x32xf32>
      %14 = vector.broadcast %13 : vector<1x32xf32> to vector<8x32xf32>
      %15 = arith.addf %12, %14 : vector<8x32xf32>
      %c0_14 = arith.constant 0 : index
      %c0_15 = arith.constant 0 : index
      %16 = vector.load %arg5[%c0_14, %c0_15] : memref<8x32xbf16, #tpu.memory_space<vmem>>, vector<8x32xbf16>
      %17 = arith.extf %16 : vector<8x32xbf16> to vector<8x32xf32>
      %18 = arith.addf %15, %17 : vector<8x32xf32>
      %cst_16 = arith.constant dense<0.000000e+00> : vector<8xf32>
      %19 = vector.multi_reduction <add>, %18, %cst_16 [1] : vector<8x32xf32> to vector<8xf32>
      %20 = vector.shape_cast %19 : vector<8xf32> to vector<8x1xf32>
      %cst_17 = arith.constant 3.200000e+01 : f32
      %21 = vector.broadcast %cst_17 : f32 to vector<8x1xf32>
      %22 = arith.divf %20, %21 : vector<8x1xf32>
      %23 = vector.broadcast %22 : vector<8x1xf32> to vector<8x32xf32>
      %24 = arith.subf %18, %23 : vector<8x32xf32>
      %25 = arith.mulf %24, %24 : vector<8x32xf32>
      %cst_18 = arith.constant dense<0.000000e+00> : vector<8xf32>
      %26 = vector.multi_reduction <add>, %25, %cst_18 [1] : vector<8x32xf32> to vector<8xf32>
      %27 = vector.shape_cast %26 : vector<8xf32> to vector<8x1xf32>
      %cst_19 = arith.constant 3.200000e+01 : f32
      %28 = vector.broadcast %cst_19 : f32 to vector<8x1xf32>
      %29 = arith.divf %27, %28 : vector<8x1xf32>
      %cst_20 = arith.constant 9.99999974E-6 : f32
      %30 = vector.broadcast %cst_20 : f32 to vector<8x1xf32>
      %31 = arith.addf %29, %30 : vector<8x1xf32>
      %32 = math.rsqrt %31 : vector<8x1xf32>
      %33 = vector.broadcast %32 : vector<8x1xf32> to vector<8x32xf32>
      %34 = arith.mulf %24, %33 : vector<8x32xf32>
      %c0_21 = arith.constant 0 : index
      %c0_22 = arith.constant 0 : index
      %35 = vector.load %arg6[%c0_21, %c0_22] : memref<1x32xf32, #tpu.memory_space<vmem>>, vector<1x32xf32>
      %36 = vector.broadcast %35 : vector<1x32xf32> to vector<8x32xf32>
      %37 = arith.mulf %34, %36 : vector<8x32xf32>
      %c0_23 = arith.constant 0 : index
      %c0_24 = arith.constant 0 : index
      %38 = vector.load %arg7[%c0_23, %c0_24] : memref<1x32xf32, #tpu.memory_space<vmem>>, vector<1x32xf32>
      %39 = vector.broadcast %38 : vector<1x32xf32> to vector<8x32xf32>
      %40 = arith.addf %37, %39 : vector<8x32xf32>
      %41 = arith.truncf %40 : vector<8x32xf32> to vector<8x32xbf16>
      %c0_25 = arith.constant 0 : index
      %c0_26 = arith.constant 0 : index
      %42 = vector.load %arg8[%c0_25, %c0_26] : memref<8x32xbf16, #tpu.memory_space<vmem>>, vector<8x32xbf16>
      tpu.vector_store %arg8[%c0_25, %c0_26], %41 {strides = array<i32>} : memref<8x32xbf16, #tpu.memory_space<vmem>>, vector<8x32xbf16>,
    } else {
    }
    return
  }
  func.func @transform_0(%arg0: i32, %arg1: i32) -> (i32, i32) {
    %c0_i32 = arith.constant 0 : i32
    return %arg0, %arg1 : i32, i32
  }
  func.func @transform_1(%arg0: i32, %arg1: i32) -> (i32, i32) {
    %c0_i32 = arith.constant 0 : i32
    %c0_i32_0 = arith.constant 0 : i32
    return %arg1, %c0_i32 : i32, i32
  }
  func.func @transform_2(%arg0: i32, %arg1: i32) -> (i32, i32) {
    %c0_i32 = arith.constant 0 : i32
    %c0_i32_0 = arith.constant 0 : i32
    %c0_i32_1 = arith.constant 0 : i32
    return %c0_i32, %c0_i32_0 : i32, i32
  }
  func.func @transform_3(%arg0: i32, %arg1: i32) -> (i32, i32) {
    %c0_i32 = arith.constant 0 : i32
    %c0_i32_0 = arith.constant 0 : i32
    return %arg0, %c0_i32 : i32, i32
  }
  func.func @transform_4(%arg0: i32, %arg1: i32) -> (i32, i32) {
    %c0_i32 = arith.constant 0 : i32
    %c0_i32_0 = arith.constant 0 : i32
    %c0_i32_1 = arith.constant 0 : i32
    return %c0_i32, %c0_i32_0 : i32, i32
  }
  func.func @transform_5(%arg0: i32, %arg1: i32) -> (i32, i32) {
    %c0_i32 = arith.constant 0 : i32
    %c0_i32_0 = arith.constant 0 : i32
    %c0_i32_1 = arith.constant 0 : i32
    return %c0_i32, %c0_i32_0 : i32, i32
  }
  func.func @transform_6(%arg0: i32, %arg1: i32) -> (i32, i32) {
    %c0_i32 = arith.constant 0 : i32
    %c0_i32_0 = arith.constant 0 : i32
    return %arg0, %c0_i32 : i32, i32
  }
}

module attributes {stable_mosaic.version = 11 : i64} {
  func.func @_linear_kernel(%arg0: i32, %arg1: i32, %arg2: i32, %arg3: memref<8x32xbf16, #tpu.memory_space<vmem>>, %arg4: memref<32x64xbf16, #tpu.memory_space<vmem>>, %arg5: memref<1x64xf32, #tpu.memory_space<vmem>>, %arg6: memref<8x64xbf16, #tpu.memory_space<vmem>>, %arg7: memref<8x64xf32, #tpu.memory_space<vmem>>) attributes {dimension_semantics = [#tpu.dimension_semantics<parallel>, #tpu.dimension_semantics<parallel>, #tpu.dimension_semantics<arbitrary>], iteration_bounds = array<i64: 2, 1, 1>, scalar_prefetch = 0 : i64, scratch_operands = 1 : i64, tpu.core_type = #tpu.core_type<tc>, window_params = [{transform_indices = @transform_0, window_bounds = array<i64: 8, 32>}, {transform_indices = @transform_1, window_bounds = array<i64: 32, 64>}, {transform_indices = @transform_2, window_bounds = array<i64: 1, 64>}, {transform_indices = @transform_3, window_bounds = array<i64: 8, 64>}]} {
    %c0_i32 = arith.constant 0 : i32
    %0 = arith.cmpi eq, %arg2, %c0_i32 : i32
    %1 = arith.extui %0 : i1 to i32
    %c0_i32_0 = arith.constant 0 : i32
    %2 = arith.cmpi ne, %1, %c0_i32_0 : i32
    scf.if %2 {
      %cst_10 = arith.constant 0.000000e+00 : f32
      %12 = vector.broadcast %cst_10 : f32 to vector<8x64xf32>
      %c0_11 = arith.constant 0 : index
      %c0_12 = arith.constant 0 : index
      %13 = vector.load %arg7[%c0_11, %c0_12] : memref<8x64xf32, #tpu.memory_space<vmem>>, vector<8x64xf32>
      tpu.vector_store %arg7[%c0_11, %c0_12], %12 {strides = array<i32>} : memref<8x64xf32, #tpu.memory_space<vmem>>, vector<8x64xf32>,
    } else {
    }
    %c0 = arith.constant 0 : index
    %c0_1 = arith.constant 0 : index
    %3 = vector.load %arg7[%c0, %c0_1] : memref<8x64xf32, #tpu.memory_space<vmem>>, vector<8x64xf32>
    %c0_2 = arith.constant 0 : index
    %c0_3 = arith.constant 0 : index
    %4 = vector.load %arg3[%c0_2, %c0_3] : memref<8x32xbf16, #tpu.memory_space<vmem>>, vector<8x32xbf16>
    %c0_4 = arith.constant 0 : index
    %c0_5 = arith.constant 0 : index
    %5 = vector.load %arg4[%c0_4, %c0_5] : memref<32x64xbf16, #tpu.memory_space<vmem>>, vector<32x64xbf16>
    %cst = arith.constant dense<0.000000e+00> : vector<8x64xf32>
    %6 = tpu.matmul %4, %5, %cst {dimension_numbers = #tpu.dot_dimension_numbers<[1], [0], [0], [1], [0, 0, 1, 1], [], []>} : vector<8x32xbf16>, vector<32x64xbf16>, vector<8x64xf32> -> vector<8x64xf32>
    %7 = arith.addf %3, %6 : vector<8x64xf32>
    %c0_6 = arith.constant 0 : index
    %c0_7 = arith.constant 0 : index
    %8 = vector.load %arg7[%c0_6, %c0_7] : memref<8x64xf32, #tpu.memory_space<vmem>>, vector<8x64xf32>
    tpu.vector_store %arg7[%c0_6, %c0_7], %7 {strides = array<i32>} : memref<8x64xf32, #tpu.memory_space<vmem>>, vector<8x64xf32>,
    %c0_i32_8 = arith.constant 0 : i32
    %9 = arith.cmpi eq, %arg2, %c0_i32_8 : i32
    %10 = arith.extui %9 : i1 to i32
    %c0_i32_9 = arith.constant 0 : i32
    %11 = arith.cmpi ne, %10, %c0_i32_9 : i32
    scf.if %11 {
      %c0_10 = arith.constant 0 : index
      %c0_11 = arith.constant 0 : index
      %12 = vector.load %arg7[%c0_10, %c0_11] : memref<8x64xf32, #tpu.memory_space<vmem>>, vector<8x64xf32>
      %c0_12 = arith.constant 0 : index
      %c0_13 = arith.constant 0 : index
      %13 = vector.load %arg5[%c0_12, %c0_13] : memref<1x64xf32, #tpu.memory_space<vmem>>, vector<1x64xf32>
      %14 = vector.broadcast %13 : vector<1x64xf32> to vector<8x64xf32>
      %15 = arith.addf %12, %14 : vector<8x64xf32>
      %cst_14 = arith.constant 0.000000e+00 : f32
      %16 = vector.broadcast %cst_14 : f32 to vector<8x64xf32>
      %17 = arith.maximumf %15, %16 : vector<8x64xf32>
      %18 = arith.truncf %17 : vector<8x64xf32> to vector<8x64xbf16>
      %c0_15 = arith.constant 0 : index
      %c0_16 = arith.constant 0 : index
      %19 = vector.load %arg6[%c0_15, %c0_16] : memref<8x64xbf16, #tpu.memory_space<vmem>>, vector<8x64xbf16>
      tpu.vector_store %arg6[%c0_15, %c0_16], %18 {strides = array<i32>} : memref<8x64xbf16, #tpu.memory_space<vmem>>, vector<8x64xbf16>,
    } else {
    }
    return
  }
  func.func @transform_0(%arg0: i32, %arg1: i32, %arg2: i32) -> (i32, i32) {
    %c0_i32 = arith.constant 0 : i32
    return %arg0, %arg2 : i32, i32
  }
  func.func @transform_1(%arg0: i32, %arg1: i32, %arg2: i32) -> (i32, i32) {
    %c0_i32 = arith.constant 0 : i32
    return %arg2, %arg1 : i32, i32
  }
  func.func @transform_2(%arg0: i32, %arg1: i32, %arg2: i32) -> (i32, i32) {
    %c0_i32 = arith.constant 0 : i32
    %c0_i32_0 = arith.constant 0 : i32
    return %c0_i32, %arg1 : i32, i32
  }
  func.func @transform_3(%arg0: i32, %arg1: i32, %arg2: i32) -> (i32, i32) {
    %c0_i32 = arith.constant 0 : i32
    return %arg0, %arg1 : i32, i32
  }
}

module attributes {stable_mosaic.version = 11 : i64} {
  func.func @_linear_kernel(%arg0: i32, %arg1: i32, %arg2: i32, %arg3: memref<8x32xbf16, #tpu.memory_space<vmem>>, %arg4: memref<32x16xbf16, #tpu.memory_space<vmem>>, %arg5: memref<1x16xf32, #tpu.memory_space<vmem>>, %arg6: memref<8x16xf32, #tpu.memory_space<vmem>>, %arg7: memref<8x16xf32, #tpu.memory_space<vmem>>) attributes {dimension_semantics = [#tpu.dimension_semantics<parallel>, #tpu.dimension_semantics<parallel>, #tpu.dimension_semantics<arbitrary>], iteration_bounds = array<i64: 2, 1, 1>, scalar_prefetch = 0 : i64, scratch_operands = 1 : i64, tpu.core_type = #tpu.core_type<tc>, window_params = [{transform_indices = @transform_0, window_bounds = array<i64: 8, 32>}, {transform_indices = @transform_1, window_bounds = array<i64: 32, 16>}, {transform_indices = @transform_2, window_bounds = array<i64: 1, 16>}, {transform_indices = @transform_3, window_bounds = array<i64: 8, 16>}]} {
    %c0_i32 = arith.constant 0 : i32
    %0 = arith.cmpi eq, %arg2, %c0_i32 : i32
    %1 = arith.extui %0 : i1 to i32
    %c0_i32_0 = arith.constant 0 : i32
    %2 = arith.cmpi ne, %1, %c0_i32_0 : i32
    scf.if %2 {
      %cst_10 = arith.constant 0.000000e+00 : f32
      %12 = vector.broadcast %cst_10 : f32 to vector<8x16xf32>
      %c0_11 = arith.constant 0 : index
      %c0_12 = arith.constant 0 : index
      %13 = vector.load %arg7[%c0_11, %c0_12] : memref<8x16xf32, #tpu.memory_space<vmem>>, vector<8x16xf32>
      tpu.vector_store %arg7[%c0_11, %c0_12], %12 {strides = array<i32>} : memref<8x16xf32, #tpu.memory_space<vmem>>, vector<8x16xf32>,
    } else {
    }
    %c0 = arith.constant 0 : index
    %c0_1 = arith.constant 0 : index
    %3 = vector.load %arg7[%c0, %c0_1] : memref<8x16xf32, #tpu.memory_space<vmem>>, vector<8x16xf32>
    %c0_2 = arith.constant 0 : index
    %c0_3 = arith.constant 0 : index
    %4 = vector.load %arg3[%c0_2, %c0_3] : memref<8x32xbf16, #tpu.memory_space<vmem>>, vector<8x32xbf16>
    %c0_4 = arith.constant 0 : index
    %c0_5 = arith.constant 0 : index
    %5 = vector.load %arg4[%c0_4, %c0_5] : memref<32x16xbf16, #tpu.memory_space<vmem>>, vector<32x16xbf16>
    %cst = arith.constant dense<0.000000e+00> : vector<8x16xf32>
    %6 = tpu.matmul %4, %5, %cst {dimension_numbers = #tpu.dot_dimension_numbers<[1], [0], [0], [1], [0, 0, 1, 1], [], []>} : vector<8x32xbf16>, vector<32x16xbf16>, vector<8x16xf32> -> vector<8x16xf32>
    %7 = arith.addf %3, %6 : vector<8x16xf32>
    %c0_6 = arith.constant 0 : index
    %c0_7 = arith.constant 0 : index
    %8 = vector.load %arg7[%c0_6, %c0_7] : memref<8x16xf32, #tpu.memory_space<vmem>>, vector<8x16xf32>
    tpu.vector_store %arg7[%c0_6, %c0_7], %7 {strides = array<i32>} : memref<8x16xf32, #tpu.memory_space<vmem>>, vector<8x16xf32>,
    %c0_i32_8 = arith.constant 0 : i32
    %9 = arith.cmpi eq, %arg2, %c0_i32_8 : i32
    %10 = arith.extui %9 : i1 to i32
    %c0_i32_9 = arith.constant 0 : i32
    %11 = arith.cmpi ne, %10, %c0_i32_9 : i32
    scf.if %11 {
      %c0_10 = arith.constant 0 : index
      %c0_11 = arith.constant 0 : index
      %12 = vector.load %arg7[%c0_10, %c0_11] : memref<8x16xf32, #tpu.memory_space<vmem>>, vector<8x16xf32>
      %c0_12 = arith.constant 0 : index
      %c0_13 = arith.constant 0 : index
      %13 = vector.load %arg5[%c0_12, %c0_13] : memref<1x16xf32, #tpu.memory_space<vmem>>, vector<1x16xf32>
      %14 = vector.broadcast %13 : vector<1x16xf32> to vector<8x16xf32>
      %15 = arith.addf %12, %14 : vector<8x16xf32>
      %c0_14 = arith.constant 0 : index
      %c0_15 = arith.constant 0 : index
      %16 = vector.load %arg6[%c0_14, %c0_15] : memref<8x16xf32, #tpu.memory_space<vmem>>, vector<8x16xf32>
      tpu.vector_store %arg6[%c0_14, %c0_15], %15 {strides = array<i32>} : memref<8x16xf32, #tpu.memory_space<vmem>>, vector<8x16xf32>,
    } else {
    }
    return
  }
  func.func @transform_0(%arg0: i32, %arg1: i32, %arg2: i32) -> (i32, i32) {
    %c0_i32 = arith.constant 0 : i32
    return %arg0, %arg2 : i32, i32
  }
  func.func @transform_1(%arg0: i32, %arg1: i32, %arg2: i32) -> (i32, i32) {
    %c0_i32 = arith.constant 0 : i32
    return %arg2, %arg1 : i32, i32
  }
  func.func @transform_2(%arg0: i32, %arg1: i32, %arg2: i32) -> (i32, i32) {
    %c0_i32 = arith.constant 0 : i32
    %c0_i32_0 = arith.constant 0 : i32
    return %c0_i32, %arg1 : i32, i32
  }
  func.func @transform_3(%arg0: i32, %arg1: i32, %arg2: i32) -> (i32, i32) {
    %c0_i32 = arith.constant 0 : i32
    return %arg0, %arg1 : i32, i32
  }
}

</mosaic_0001>

<bundles_post_ra>
// kernel: transformer_forward.12
= control target key start
LH: loop header
LB: loop body
LE: loop exit
PB: predicated region body
PF: predicated region fallthrough
CT: control target
= control target key end

     0   :  { %s619_s15 = smov 0   ;;  %s621_s16 = smov 0   ;;  %s661_s0 = inlined_call_operand.vmem [shape: bf16[2,8,16], index: 0, kind: input, shape index: {}]   ;;  %s662_s1 = inlined_call_operand.vmem [shape: bf16[16,32], index: 1, kind: input, shape index: {}]   ;;  %s663_s2 = inlined_call_operand.vmem [shape: f32[1,32], index: 2, kind: input, shape index: {}]   ;;  %s664_s3 = inlined_call_operand.vmem [shape: f32[8,32], index: 3, kind: input, shape index: {}]   ;;  %s665_s4 = inlined_call_operand.vmem [shape: bf16[2,8,32], index: 4, kind: output, shape index: {}]  }
   0x1   :  { %s623_s17 = smov 0  }
   0x2 LB: > { %s40_s18 = sadd.s32 1, %s587_s16  ;;  %p532_p0 = scmp.ge.s32.totalorder %s591_s17, 1  ;;  %s591_s17 = sphi %s623_s17, %s14_s17   ;;  %s587_s16 = sphi %s621_s16, %s667_s16   ;;  %s583_s15 = sphi %s619_s15, %s666_s15  }
   0x3   : > { %p42_p1 = scmp.ge.s32.totalorder %s40_s18, 2  ;;  %p239_p2 = scmp.lt.s32.totalorder %s591_s17, 3 }
   0x5   : > { %s669_s18 = smov (%p42_p1, %s40_s18), 0  ;;  %p240_p3 = pnand %p532_p0, %p239_p2 }
   0x6   : > { %p293_p4 = scmp.lt.s32.totalorder (!%p240_p3), %s583_s15, 1 }
   0x7   : > { %243 = sbr.rel (%p240_p3) target bundleno = 159 (0x9f), region = 36 }
   0xc   : > { %v542_v0 = vld [vmem:[%s662_s1] sm:$0xff]  ;;  %vm337_vm0 = vcmask 261120   ;;  %v593_v1 = vmov 0.0   ;;  %s671_s15 = smov (!%p293_p4, %s583_s15), 1  ;;  %vm349_vm1 = vcmask 130048   ;;  %vm381_vm2 = vcmask 257024  }
   0xd   : > { %338 = vst.msk [vmem:[#allocation2] sm:$0xff] %vm337_vm0, %v593_v1  ;;  %360 = vmatpush.bf16.msra.mxu0 %v542_v0  ;;  %s533_s21 = sshll.u32 %s671_s15, 2  ;;  %v568_v6 = vld [vmem:[%s663_s2] ss:$0 sm:$0xff] }
   0xe   : > { %s302_s24 = scalar_lea.vmem %s661_s0, %s533_s21  ;;  %v378_v9 = vld [vmem:[%s664_s3] sm:$0xff]  ;;  %s331_s5 = scalar_lea.vmem %s665_s4, %s533_s21 }
   0xf   : > { %v340_v2 = vld [vmem:[%s302_s24] sm:$0xf] }
  0x10   : > { %539 = vmatmul.msk.bf16.vlgmr.msra.gmra.mxu0 %vm349_vm1, %v340_v2 }
  0x14   : > { %v339_v3 = vld [vmem:[#allocation2] sm:$0xff] }
  0x8d   : > { %v362_v4 = vpop.f32.mrf.mxu0 }
  0x8e   : > { %v366_v5 = vadd.f32 %v362_v4, %v339_v3 }
  0x90   : > { %368 = vst.msk [vmem:[#allocation2] sm:$0xff] %vm337_vm0, %v366_v5 }
  0x95   : > { %v364_v7 = vpop.f32.mrf.mxu0 }
  0x97   : > { %v372_v8 = vld [vmem:[#allocation2] sm:$0xff] }
  0x98   : > { %v377_v10 = vadd.f32 %v568_v6, %v372_v8 }
  0x9a   : > { %v379_v11 = vadd.f32 %v378_v9, %v377_v10 }
  0x9c   : > { %v380_v12 = vpack.c.bf16 %v379_v11, %v379_v11 }
  0x9e   : > { %382 = vst.msk [vmem:[%s331_s5] sm:$0xf] %vm381_vm2, %v380_v12 }
  0x9f PF: > { %s14_s17 = sadd.s32 1, %s591_s17   ;;  %s666_s15 = smov %s587_s16 }
  0xa0   : > { %p11_p5 = scmp.ge.s32.totalorder %s14_s17, 4   ;;  %s667_s16 = smov %s669_s18 }
  0xa2   :  { %13 = sbr.rel (!%p11_p5) target bundleno = 2 (0x2), region = 83 }

// kernel: transformer_forward.13
= control target key start
LH: loop header
LB: loop body
LE: loop exit
PB: predicated region body
PF: predicated region fallthrough
CT: control target
= control target key end

     0   :  { %s509_s12 = smov 0   ;;  %s511_s13 = smov 0   ;;  %s551_s0 = inlined_call_operand.vmem [shape: bf16[16,32], index: 0, kind: input, shape index: {}]   ;;  %s552_s1 = inlined_call_operand.vmem [shape: bf16[32,96], index: 1, kind: input, shape index: {}]   ;;  %s553_s2 = inlined_call_operand.vmem [shape: f32[1,96], index: 2, kind: input, shape index: {}]   ;;  %s554_s3 = inlined_call_operand.vmem [shape: bf16[16,96], index: 3, kind: output, shape index: {}]  }
   0x1   :  { %s513_s14 = smov 0  }
   0x2 LB: > { %s32_s15 = sadd.s32 1, %s482_s13  ;;  %p422_p0 = scmp.ge.s32.totalorder %s486_s14, 1  ;;  %s486_s14 = sphi %s513_s14, %s13_s14   ;;  %s482_s13 = sphi %s511_s13, %s556_s13   ;;  %s478_s12 = sphi %s509_s12, %s555_s12  }
   0x3   : > { %p34_p1 = scmp.ge.s32.totalorder %s32_s15, 2  ;;  %p186_p2 = scmp.lt.s32.totalorder %s486_s14, 3 }
   0x5   : > { %s558_s15 = smov (%p34_p1, %s32_s15), 0  ;;  %p187_p3 = pnand %p422_p0, %p186_p2 }
   0x6   : > { %p225_p4 = scmp.lt.s32.totalorder (!%p187_p3), %s478_s12, 1 }
   0x7   : > { %190 = sbr.rel (%p187_p3) target bundleno = 161 (0xa1), region = 32 }
   0xc   : > { %v437_v0 = vld [vmem:[%s552_s1 + $0x8] sm:$0xff]  ;;  %vm256_vm0 = vcmask 785408   ;;  %v488_v1 = vmov 0.0   ;;  %v436_v2 = vld [vmem:[%s552_s1] sm:$0xff]  ;;  %s560_s12 = smov (!%p225_p4, %s478_s12), 1  ;;  %vm276_vm1 = vcmask 261120  }
   0xd   : > { %257 = vst.msk [vmem:[#allocation2] sm:$0xff] %vm256_vm0, %v488_v1  ;;  %286 = vmatpush.bf16.msra.mxu0 %v437_v0  ;;  %s423_s20 = sshll.u32 %s560_s12, 2  ;;  %v463_v7 = vld [vmem:[%s553_s2] ss:$0 sm:$0xff]  ;;  %vm306_vm2 = vcmask 781312  }
   0xe   : > { %s231_s23 = scalar_lea.vmem %s551_s0, %s423_s20  ;;  %s250_s28 = scalar_lea.vmem %s554_s3, %s423_s20 }
   0xf   : > { %v259_v3 = vld [vmem:[%s231_s23] sm:$0xf] }
  0x11   : > { %287 = vmatpush.bf16.msra.mxu0 %v436_v2 }
  0x14   : > { %433 = vmatmul.msk.bf16.vlgmr.msra.gmra.mxu0 %vm276_vm1, %v259_v3  ;;  %v258_v4 = vld [vmem:[#allocation2] sm:$0xff] }
  0x91   : > { %v289_v5 = vpop.f32.mrf.mxu0 }
  0x92   : > { %v293_v6 = vadd.f32 %v289_v5, %v258_v4 }
  0x94   : > { %295 = vst.msk [vmem:[#allocation2] sm:$0xff] %vm256_vm0, %v293_v6 }
  0x99   : > { %v291_v8 = vpop.f32.mrf.mxu0 }
  0x9b   : > { %v299_v9 = vld [vmem:[#allocation2] sm:$0xff] }
  0x9c   : > { %v304_v10 = vadd.f32 %v463_v7, %v299_v9 }
  0x9e   : > { %v305_v11 = vpack.c.bf16 %v304_v10, %v304_v10 }
  0xa0   : > { %307 = vst.msk [vmem:[%s250_s28] sm:$0xf] %vm306_vm2, %v305_v11 }
  0xa1 PF: > { %s13_s14 = sadd.s32 1, %s486_s14   ;;  %s555_s12 = smov %s482_s13 }
  0xa2   : > { %p10_p5 = scmp.ge.s32.totalorder %s13_s14, 4   ;;  %s556_s13 = smov %s558_s15 }
  0xa4   :  { %12 = sbr.rel (!%p10_p5) target bundleno = 2 (0x2), region = 76 }

// kernel: transformer_forward.15
= control target key start
LH: loop header
LB: loop body
LE: loop exit
PB: predicated region body
PF: predicated region fallthrough
CT: control target
= control target key end

     0   :  { %s615_s21 = smov 0   ;;  %s617_s22 = smov 0   ;;  %s676_s0 = inlined_call_operand.vmem [shape: bf16[16,32], index: 0, kind: input, shape index: {}]   ;;  %s677_s1 = inlined_call_operand.vmem [shape: bf16[32,32], index: 1, kind: input, shape index: {}]   ;;  %s678_s2 = inlined_call_operand.vmem [shape: f32[1,32], index: 2, kind: input, shape index: {}]   ;;  %s679_s3 = inlined_call_operand.vmem [shape: bf16[16,32], index: 3, kind: input, shape index: {}]   ;;  %s680_s4 = inlined_call_operand.vmem [shape: f32[1,32], index: 4, kind: input, shape index: {}]   ;;  %s681_s5 = inlined_call_operand.vmem [shape: f32[1,32], index: 5, kind: input, shape index: {}]   ;;  %s682_s6 = inlined_call_operand.vmem [shape: bf16[16,32], index: 6, kind: output, shape index: {}]  }
   0x1   :  { %s619_s23 = smov 0  }
   0x2 LB: > { %s28_s24 = sadd.s32 1, %s572_s22  ;;  %p504_p0 = scmp.ge.s32.totalorder %s576_s23, 1  ;;  %s576_s23 = sphi %s619_s23, %s16_s23   ;;  %s572_s22 = sphi %s617_s22, %s684_s22   ;;  %s568_s21 = sphi %s615_s21, %s683_s21  }
   0x3   : > { %p30_p1 = scmp.ge.s32.totalorder %s28_s24, 2  ;;  %p248_p2 = scmp.lt.s32.totalorder %s576_s23, 3 }
   0x5   : > { %s686_s24 = smov (%p30_p1, %s28_s24), 0  ;;  %p249_p3 = pnand %p504_p0, %p248_p2 }
   0x6   : > { %p288_p4 = scmp.lt.s32.totalorder (!%p249_p3), %s568_s21, 1 }
   0x7   : > { %252 = sbr.rel (%p249_p3) target bundleno = 431 (0x1af), region = 44 }
   0xc   : > { %v520_v0 = vld [vmem:[%s677_s1 + $0x8] sm:$0xff]  ;;  %vm314_vm0 = vcmask 261120   ;;  %v578_v1 = vmov 0.0   ;;  %v519_v2 = vld [vmem:[%s677_s1] sm:$0xff]  ;;  %s688_s21 = smov (!%p288_p4, %s568_s21), 1  ;;  %v579_v15 = vmov 32.0  }
   0xd   : > { %315 = vst.msk [vmem:[#allocation2] sm:$0xff] %vm314_vm0, %v578_v1  ;;  %344 = vmatpush.bf16.msra.mxu0 %v520_v0  ;;  %s640_s29 = sshll.u32 %s688_s21, 2  ;;  %v547_v8 = vld [vmem:[%s678_s2] ss:$0 sm:$0xff]  ;;  %550 = vrcp.f32 %v579_v15  ;;  %vm405_vm5 = vcmask 257024  }
   0xe   : > { %s294_s8 = scalar_lea.vmem %s676_s0, %s640_s29  ;;  %s304_s11 = scalar_lea.vmem %s679_s3, %s640_s29  ;;  %v548_v36 = vld [vmem:[%s680_s4] ss:$0 sm:$0xff] }
   0xf   : > { %v317_v3 = vld [vmem:[%s294_s8] sm:$0xf]  ;;  %s308_s20 = scalar_lea.vmem %s682_s6, %s640_s29 }
  0x10   : > { %v362_v7 = vld [vmem:[%s304_s11] sm:$0xf] }
  0x11   : > { %345 = vmatpush.bf16.msra.mxu0 %v519_v2  ;;  %v363_v10 = vunpack.c.l.bf16 %v362_v7  ;;  %v549_v38 = vld [vmem:[%s681_s5] ss:$0 sm:$0xff] }
  0x13   : > { %v551_v16 = vpop.eup %550 }
  0x14   : > { %516 = vmatmul.msk.bf16.vlgmr.msra.gmra.mxu0 %vm314_vm0, %v317_v3  ;;  %v316_v4 = vld [vmem:[#allocation2] sm:$0xff]  ;;  %v369_v17 = vmul.f32 32.0, %v551_v16  ;;  %vm373_vm1 = vweird.f32 %v551_v16 }
  0x16   : > { %v370_v18 = vsub.f32 1.0, %v369_v17 }
  0x18   : > { %v371_v19 = vmul.f32 %v551_v16, %v370_v18 }
  0x1a   : > { %v372_v20 = vadd.f32 %v551_v16, %v371_v19 }
  0x1c   : > { %v374_v21 = vsel %vm373_vm1, %v551_v16, %v372_v20 }
  0x91   : > { %v347_v5 = vpop.f32.mrf.mxu0 }
  0x92   : > { %v351_v6 = vadd.f32 %v347_v5, %v316_v4 }
  0x94   : > { %352 = vst.msk [vmem:[#allocation2] sm:$0xff] %vm314_vm0, %v351_v6 }
  0x99   : > { %v349_v9 = vpop.f32.mrf.mxu0 }
  0x9b   : > { %v356_v11 = vld [vmem:[#allocation2] sm:$0xff] }
  0x9c   : > { %v361_v12 = vadd.f32 %v547_v8, %v356_v11 }
  0x9e   : > { %v364_v13 = vadd.f32 %v363_v10, %v361_v12 }
  0xa0   : > { %v365_v14 = vsel %vm314_vm0, %v364_v13, 0.0 }
  0xa1   : > { %366 = vadd.xlane.f32.xlu0 %v365_v14 }
 0x114   : > { %v367_v22 = vpop.xlane.xlu0 %366 }
 0x115   : > { %v375_v23 = vmul.f32 %v374_v21, %v367_v22 }
 0x117   : > { %v376_v24 = vsub.f32 %v364_v13, %v375_v23 }
 0x119   : > { %v377_v25 = vmul.f32 %v376_v24, %v376_v24 }
 0x11b   : > { %v378_v26 = vsel %vm314_vm0, %v377_v25, 0.0 }
 0x11c   : > { %379 = vadd.xlane.f32.xlu0 %v378_v26 }
 0x18f   : > { %v380_v27 = vpop.xlane.xlu0 %379 }
 0x190   : > { %v381_v28 = vmul.f32 %v380_v27, %v374_v21 }
 0x192   : > { %v382_v29 = vadd.f32 1e-05, %v381_v28 }
 0x194   : > { %552 = vrsqrt.f32 %v382_v29  ;;  %vm389_vm3 = vweird.f32 %v382_v29 }
 0x19a   : > { %v553_v30 = vpop.eup %552 }
 0x19b   : > { %v384_v31 = vmul.f32 %v553_v30, %v382_v29  ;;  %vm390_vm2 = vweird.f32 %v553_v30 }
 0x19c   : > { %vm391_vm4 = vmor %vm389_vm3, %vm390_vm2 }
 0x19d   : > { %v385_v32 = vmul.f32 %v553_v30, %v384_v31 }
 0x19f   : > { %v386_v33 = vmul.f32 0.5, %v385_v32 }
 0x1a1   : > { %v387_v34 = vsub.f32 1.5, %v386_v33 }
 0x1a3   : > { %v388_v35 = vmul.f32 %v553_v30, %v387_v34 }
 0x1a5   : > { %v392_v37 = vsel %vm391_vm4, %v553_v30, %v388_v35 }
 0x1a6   : > { %v393_v39 = vmul.f32 %v392_v37, %v376_v24 }
 0x1a8   : > { %v398_v40 = vmul.f32 %v548_v36, %v393_v39 }
 0x1aa   : > { %v403_v41 = vadd.f32 %v549_v38, %v398_v40 }
 0x1ac   : > { %v404_v42 = vpack.c.bf16 %v403_v41, %v403_v41 }
 0x1ae   : > { %406 = vst.msk [vmem:[%s308_s20] sm:$0xf] %vm405_vm5, %v404_v42 }
 0x1af PF: > { %s16_s23 = sadd.s32 1, %s576_s23   ;;  %s683_s21 = smov %s572_s22 }
 0x1b0   : > { %p13_p5 = scmp.ge.s32.totalorder %s16_s23, 4   ;;  %s684_s22 = smov %s686_s24 }
 0x1b2   :  { %15 = sbr.rel (!%p13_p5) target bundleno = 2 (0x2), region = 88 }

// kernel: transformer_forward.14
= control target key start
LH: loop header
LB: loop body
LE: loop exit
PB: predicated region body
PF: predicated region fallthrough
CT: control target
= control target key end

     0   :  { %s753_s15 = smov 0   ;;  %s755_s16 = smov 0   ;;  %s824_s0 = inlined_call_operand.vmem [shape: bf16[2,8,32], index: 0, kind: input, shape index: {}]   ;;  %s825_s1 = inlined_call_operand.vmem [shape: bf16[2,8,32], index: 1, kind: input, shape index: {}]   ;;  %s826_s2 = inlined_call_operand.vmem [shape: bf16[2,8,32], index: 2, kind: input, shape index: {}]   ;;  %s827_s3 = inlined_call_operand.vmem [shape: f32[2,1,8], index: 3, kind: input, shape index: {}]   ;;  %s828_s4 = inlined_call_operand.vmem [shape: bf16[2,8,32], index: 4, kind: output, shape index: {}]  }
   0x1   :  { %s757_s17 = smov 0  }
   0x2 LB: > { %s33_s18 = sadd.s32 1, %s716_s16  ;;  %p642_p0 = scmp.ge.s32.totalorder %s720_s17, 1  ;;  %s720_s17 = sphi %s757_s17, %s14_s17   ;;  %s716_s16 = sphi %s755_s16, %s830_s16   ;;  %s712_s15 = sphi %s753_s15, %s829_s15  }
   0x3   : > { %p35_p1 = scmp.ge.s32.totalorder %s33_s18, 2  ;;  %p228_p2 = scmp.lt.s32.totalorder %s720_s17, 3 }
   0x5   : > { %s832_s18 = smov (%p35_p1, %s33_s18), 0  ;;  %p229_p3 = pnand %p642_p0, %p228_p2 }
   0x6   : > { %p278_p4 = scmp.lt.s32.totalorder (!%p229_p3), %s712_s15, 1  ;;  %s722_s29 = smov (!%p229_p3), 112  }
   0x7   : > { %232 = sbr.rel (%p229_p3) target bundleno = 763 (0x2fb), region = 36  ;;  %s727_s7 = smov (!%p229_p3), 16  }
   0xc   : > { %s834_s15 = smov (!%p278_p4, %s712_s15), 1  ;;  %vm329_vm0 = vcmask 130048   ;;  %vm317_vm1 = vcmask 15360   ;;  %v723_v7 = vmov -inf   ;;  %vm350_vm2 = vcmask 64512  }
   0xd   : > { %s771_s19 = sshll.u32 %s834_s15, 2  ;;  %s304_s28 = scalar_lea.vmem %s827_s3, %s834_s15  ;;  %318 = vst.msk [vmem:[#allocation2] sm:$0xff] %vm317_vm1, %v723_v7  ;;  %v724_v16 = vmov 0   ;;  %vm372_vm3 = vcmask 7168   ;;  %v725_v25 = vmov 0.0   ;;  %vm385_vm4 = vcmask 1043456  }
   0xe   : > { %s291_s22 = scalar_lea.vmem %s825_s1, %s771_s19  ;;  %s284_s25 = scalar_lea.vmem %s824_s0, %s771_s19  ;;  %v687_v11 = vld [vmem:[%s304_s28] ss:$0 sm:$0xff]  ;;  %684 = vset.pattern.permute.xlu0 %v724_v16  ;;  %685 = vset.pattern.permute.xlu1 %v724_v16  ;;  %319 = vst.msk [vmem:[#allocation3] sm:$0xff] %vm317_vm1, %v725_v25  ;;  %v726_v27 = vmov 1   ;;  %vm456_vm5 = vcmask 15368   ;;  %vm320_vm6 = vcmask 261120  }
   0xf   : > { %v323_v0 = vld [vmem:[%s291_s22] sm:$0xf]  ;;  %s298_s6 = scalar_lea.vmem %s826_s2, %s771_s19  ;;  %683 = vset.pattern.permute.xlu2 %v726_v27  ;;  %321 = vst.msk [vmem:[#allocation4] sm:$0xff] %vm320_vm6, %v725_v25  ;;  %vm495_vm7 = vcmask 261248   ;;  %s311_s10 = scalar_lea.vmem %s828_s4, %s771_s19  ;;  %vm517_vm8 = vcmask 257024  }
  0x10   : > { %v334_v1 = vsel %vm329_vm0, %v323_v0, 0  ;;  %v411_v2 = vunpack.c.l.b16 %v323_v0  ;;  %v322_v3 = vld [vmem:[%s284_s25] sm:$0xf] }
  0x11   : > { %343 = vmatpush.bf16.xpose.msra.mxu0 %v334_v1  ;;  %v406_v5 = vunpack.c.l.b16 %v322_v3  ;;  %v324_v26 = vld [vmem:[%s298_s6] sm:$0xf] }
  0x12   : > { %v412_v4 = vpack.c.b16 %v411_v2, %v411_v2  ;;  %v387_v28 = vsel %vm385_vm4, %v324_v26, 0  ;;  %v467_v37 = vunpack.c.l.b16 %v324_v26 }
  0x13   : > { %v407_v6 = vpack.c.b16 %v406_v5, %v406_v5  ;;  %396 = vmatpush.bf16.msra.mxu1 %v387_v28 }
  0x14   : > { %413 = vrot.lane.b32.xlu0 %v412_v4, %s722_s29  ;;  %v349_v17 = vld [vmem:[#allocation2] sm:$0xff]  ;;  %v468_v41 = vpack.c.b16 %v467_v37, %v467_v37 }
  0x15   : > { %v366_v53 = vld [vmem:[#allocation3] sm:$0xff] }
  0x16   : > { %v374_v59 = vld [vmem:[#allocation4] sm:$0xff] }
  0x18   : > { %647 = vmatmul.msk.bf16.vlgmr.msra.gmra.mxu0 %vm329_vm0, %v322_v3 }
  0x1c   : > { %408 = vrot.lane.b32.xlu0 %v407_v6, %s722_s29 }
  0x86   : > { %v414_v8 = vpop.permute.xlu0 %413 }
  0x87   : > { %v419_v9 = vsel %vm329_vm0, %v414_v8, 0 }
  0x88   : > { %428 = vmatpush.bf16.xpose.msra.mxu2 %v419_v9 }
  0x8e   : > { %v409_v10 = vpop.permute.xlu0 %408 }
  0x8f   : > { %649 = vmatmul.msk.bf16.vlgmr.msra.gmra.mxu2 %vm329_vm0, %v409_v10 }
  0x95   : > { %v345_v12 = vpop.f32.mrf.mxu0 }
  0x96   : > { %v346_v13 = vadd.f32 %v687_v11, %v345_v12 }
  0x98   : > { %v351_v14 = vsel %vm350_vm2, %v346_v13, -inf }
  0x99   : > { %352 = vmax.xlane.f32.xlu1 %v351_v14 }
  0x9d   : > { %v347_v15 = vpop.f32.mrf.mxu0 }
 0x10c   : > { %v353_v18 = vpop.xlane.xlu1 %352 }
 0x10d   : > { %v354_v19 = vmax.f32 %v349_v17, %v353_v18 }
 0x10f   : > { %v355_v20 = vsub.f32 %v349_v17, %v354_v19  ;;  %404 = vst.msk [vmem:[#allocation2] sm:$0xff] %vm372_vm3, %v354_v19  ;;  %360 = vperm.xlu0 %684, %v354_v19  }
 0x111   : > { %v356_v43 = vmul.f32 1.442695, %v355_v20 }
 0x112   : > { %v430_v21 = vpop.f32.mrf.mxu2 }
 0x113   : > { %v431_v22 = vadd.f32 %v687_v11, %v430_v21 }
 0x115   : > { %v435_v23 = vsel %vm350_vm2, %v431_v22, -inf }
 0x116   : > { %436 = vmax.xlane.f32.xlu1 %v435_v23  ;;  %v434_v32 = vld [vmem:[#allocation2] sm:$0xff] }
 0x117   : > { %686 = vset.pattern.permute.xlu0 %v726_v27 }
 0x11a   : > { %v432_v24 = vpop.f32.mrf.mxu2 }
 0x181   : > { %v361_v29 = vpop.permute.xlu0 %360 }
 0x182   : > { %v363_v30 = vsub.f32 %v346_v13, %v361_v29 }
 0x184   : > { %v364_v31 = vmul.f32 1.442695, %v363_v30 }
 0x186   : > { %688 = vpow2.f32 %v364_v31 }
 0x189   : > { %v437_v33 = vpop.xlane.xlu1 %436 }
 0x18a   : > { %v438_v34 = vmax.f32 %v434_v32, %v437_v33 }
 0x18c   : > { %v689_v35 = vpop.eup %688  ;;  %v439_v36 = vsub.f32 %v434_v32, %v438_v34  ;;  %497 = vst.msk [vmem:[#allocation2] sm:$0xff] %vm456_vm5, %v438_v34  ;;  %444 = vperm.xlu2 %683, %v438_v34  }
 0x18d   : > { %v368_v38 = vsel %vm350_vm2, %v689_v35, 0.0  ;;  %v381_v39 = vpack.c.bf16 %v689_v35, %v689_v35 }
 0x18e   : > { %v440_v40 = vmul.f32 1.442695, %v439_v36  ;;  %369 = vadd.xlane.f32.xlu1 %v368_v38 }
 0x18f   : > { %648 = vmatmul.msk.bf16.vlgmr.msra.gmra.mxu1 %vm350_vm2, %v381_v39 }
 0x190   : > { %690 = vpow2.f32 %v440_v40 }
 0x191   : > { %692 = vpow2.f32 %v356_v43 }
 0x194   : > { %469 = vrot.lane.b32.xlu2 %v468_v41, %s722_s29 }
 0x196   : > { %v691_v42 = vpop.eup %690 }
 0x197   : > { %461 = vperm.xlu0 %686, %v691_v42   ;;  %v693_v44 = vpop.eup %692 }
 0x198   : > { %v367_v54 = vmul.f32 %v693_v44, %v366_v53 }
 0x1a7   : > { %377 = vperm.xlu1 %685, %v693_v44  }
 0x1e6   : > { %v445_v45 = vpop.permute.xlu2 %444 }
 0x1e7   : > { %v447_v46 = vsub.f32 %v431_v22, %v445_v45 }
 0x1e9   : > { %v448_v47 = vmul.f32 1.442695, %v447_v46 }
 0x1eb   : > { %694 = vpow2.f32 %v448_v47 }
 0x1ee   : > { %v470_v48 = vpop.permute.xlu2 %469 }
 0x1ef   : > { %v475_v49 = vsel %vm385_vm4, %v470_v48, 0 }
 0x1f0   : > { %484 = vmatpush.bf16.msra.mxu3 %v475_v49 }
 0x1f1   : > { %v695_v50 = vpop.eup %694 }
 0x1f2   : > { %v452_v51 = vsel %vm350_vm2, %v695_v50, 0.0  ;;  %v465_v52 = vpack.c.bf16 %v695_v50, %v695_v50 }
 0x1f3   : > { %453 = vadd.xlane.f32.xlu2 %v452_v51 }
 0x1f4   : > { %650 = vmatmul.msk.bf16.vlgmr.msra.gmra.mxu3 %vm350_vm2, %v465_v52 }
 0x201   : > { %v370_v55 = vpop.xlane.xlu1 %369 }
 0x202   : > { %v371_v56 = vadd.f32 %v370_v55, %v367_v54 }
 0x204   : > { %373 = vst.msk [vmem:[#allocation3] sm:$0xff] %vm372_vm3, %v371_v56 }
 0x209   : > { %v462_v7 = vpop.permute.xlu0 %461 }
 0x20b   : > { %v450_v63 = vld [vmem:[#allocation3] sm:$0xff] }
 0x20c   : > { %v398_v57 = vpop.f32.mrf.mxu1  ;;  %v451_v0 = vmul.f32 %v691_v42, %v450_v63 }
 0x214   : > { %v400_v58 = vpop.f32.mrf.mxu1 }
 0x219   : > { %v378_v60 = vpop.permute.xlu1 %377 }
 0x21a   : > { %v380_v61 = vmul.f32 %v378_v60, %v374_v59 }
 0x21c   : > { %v402_v62 = vadd.f32 %v398_v57, %v380_v61 }
 0x21e   : > { %403 = vst.msk [vmem:[#allocation4] sm:$0xff] %vm329_vm0, %v402_v62 }
 0x225   : > { %v458_v8 = vld [vmem:[#allocation4] sm:$0xff] }
 0x226   : > { %v464_v9 = vmul.f32 %v462_v7, %v458_v8 }
 0x266   : > { %v454_v1 = vpop.xlane.xlu2 %453 }
 0x267   : > { %v455_v2 = vadd.f32 %v454_v1, %v451_v0 }
 0x269   : > { %457 = vst.msk [vmem:[#allocation3] sm:$0xff] %vm456_vm5, %v455_v2 }
 0x270   : > { %v501_v3 = vld [vmem:[#allocation3] sm:$0xff] }
 0x271   : > { %696 = vrcp.f32 %v501_v3 }
 0x277   : > { %v697_v4 = vpop.eup %696  ;;  %v486_v5 = vpop.f32.mrf.mxu3 }
 0x278   : > { %491 = vrot.lane.b32.xlu0 %v486_v5, %s727_s7  ;;  %506 = vperm.xlu1 %685, %v697_v4  }
 0x27f   : > { %v488_v6 = vpop.f32.mrf.mxu3 }
 0x280   : > { %511 = vperm.xlu0 %686, %v697_v4  }
 0x2ea   : > { %v492_v10 = vpop.permute.xlu0 %491  ;;  %v507_v13 = vpop.permute.xlu1 %506 }
 0x2eb   : > { %v494_v11 = vadd.f32 %v492_v10, %v464_v9 }
 0x2ed   : > { %496 = vst.msk [vmem:[#allocation4] sm:$0xff] %vm495_vm7, %v494_v11 }
 0x2f2   : > { %v512_v14 = vpop.permute.xlu0 %511 }
 0x2f4   : > { %v503_v12 = vld [vmem:[#allocation4] sm:$0xff] }
 0x2f5   : > { %v509_v15 = vmul.f32 %v507_v13, %v503_v12  ;;  %v514_v16 = vmul.f32 %v512_v14, %v503_v12 }
 0x2f7   : > { %v515_v17 = vsel %vm329_vm0, %v509_v15, %v514_v16 }
 0x2f8   : > { %v516_v18 = vpack.c.bf16 %v515_v17, %v515_v17 }
 0x2fa   : > { %518 = vst.msk [vmem:[%s311_s10] sm:$0xf] %vm517_vm8, %v516_v18 }
 0x2fb PF: > { %s14_s17 = sadd.s32 1, %s720_s17   ;;  %s829_s15 = smov %s716_s16 }
 0x2fc   : > { %p11_p5 = scmp.ge.s32.totalorder %s14_s17, 4   ;;  %s830_s16 = smov %s832_s18 }
 0x2fe   :  { %13 = sbr.rel (!%p11_p5) target bundleno = 2 (0x2), region = 83 }

// kernel: transformer_forward.17
= control target key start
LH: loop header
LB: loop body
LE: loop exit
PB: predicated region body
PF: predicated region fallthrough
CT: control target
= control target key end

     0   :  { %s642_s21 = smov 0   ;;  %s644_s22 = smov 0   ;;  %s708_s0 = inlined_call_operand.vmem [shape: bf16[16,64], index: 0, kind: input, shape index: {}]   ;;  %s709_s1 = inlined_call_operand.vmem [shape: bf16[64,32], index: 1, kind: input, shape index: {}]   ;;  %s710_s2 = inlined_call_operand.vmem [shape: f32[1,32], index: 2, kind: input, shape index: {}]   ;;  %s711_s3 = inlined_call_operand.vmem [shape: bf16[16,32], index: 3, kind: input, shape index: {}]   ;;  %s712_s4 = inlined_call_operand.vmem [shape: f32[1,32], index: 4, kind: input, shape index: {}]   ;;  %s713_s5 = inlined_call_operand.vmem [shape: f32[1,32], index: 5, kind: input, shape index: {}]   ;;  %s714_s6 = inlined_call_operand.vmem [shape: bf16[16,32], index: 6, kind: output, shape index: {}]  }
   0x1   :  { %s646_s23 = smov 0  }
   0x2 LB: > { %s28_s24 = sadd.s32 1, %s599_s22  ;;  %p521_p0 = scmp.ge.s32.totalorder %s603_s23, 1  ;;  %s603_s23 = sphi %s646_s23, %s16_s23   ;;  %s599_s22 = sphi %s644_s22, %s716_s22   ;;  %s595_s21 = sphi %s642_s21, %s715_s21  }
   0x3   : > { %p30_p1 = scmp.ge.s32.totalorder %s28_s24, 2  ;;  %p248_p2 = scmp.lt.s32.totalorder %s603_s23, 3 }
   0x5   : > { %s718_s24 = smov (%p30_p1, %s28_s24), 0  ;;  %p249_p3 = pnand %p521_p0, %p248_p2 }
   0x6   : > { %p288_p4 = scmp.lt.s32.totalorder (!%p249_p3), %s595_s21, 1 }
   0x7   : > { %252 = sbr.rel (%p249_p3) target bundleno = 439 (0x1b7), region = 44 }
   0xc   : > { %v547_v0 = vld [vmem:[%s709_s1 + $0x18] sm:$0xff]  ;;  %vm314_vm0 = vcmask 261120   ;;  %v546_v1 = vld [vmem:[%s709_s1 + $0x10] sm:$0xff]  ;;  %v605_v2 = vmov 0.0   ;;  %s720_s21 = smov (!%p288_p4, %s595_s21), 1  ;;  %v545_v3 = vld [vmem:[%s709_s1 + $0x8] sm:$0xff] }
   0xd   : > { %358 = vmatpush.bf16.msra.mxu0 %v547_v0  ;;  %315 = vst.msk [vmem:[#allocation2] sm:$0xff] %vm314_vm0, %v605_v2  ;;  %s670_s7 = sshll.u32 %s720_s21, 2  ;;  %v544_v4 = vld [vmem:[%s709_s1] sm:$0xff]  ;;  %vm350_vm1 = vcmask 523264   ;;  %v606_v17 = vmov 32.0   ;;  %vm422_vm6 = vcmask 257024  }
   0xe   : > { %s294_s12 = scalar_lea.vmem %s708_s0, %s670_s7  ;;  %s304_s15 = scalar_lea.vmem %s711_s3, %s670_s7  ;;  %v574_v10 = vld [vmem:[%s710_s2] ss:$0 sm:$0xff]  ;;  %577 = vrcp.f32 %v606_v17 }
   0xf   : > { %v317_v5 = vld [vmem:[%s294_s12] sm:$0xf]  ;;  %s308_s27 = scalar_lea.vmem %s714_s6, %s670_s7 }
  0x10   : > { %v379_v9 = vld [vmem:[%s304_s15] sm:$0xf] }
  0x11   : > { %359 = vmatpush.bf16.msra.mxu0 %v546_v1  ;;  %v380_v12 = vunpack.c.l.bf16 %v379_v9  ;;  %v575_v38 = vld [vmem:[%s712_s4] ss:$0 sm:$0xff] }
  0x12   : > { %v576_v40 = vld [vmem:[%s713_s5] ss:$0 sm:$0xff] }
  0x14   : > { %v316_v6 = vld [vmem:[#allocation2] sm:$0xff]  ;;  %v578_v18 = vpop.eup %577 }
  0x15   : > { %360 = vmatpush.bf16.msra.mxu0 %v545_v3  ;;  %v386_v19 = vmul.f32 32.0, %v578_v18  ;;  %vm390_vm2 = vweird.f32 %v578_v18 }
  0x17   : > { %v387_v20 = vsub.f32 1.0, %v386_v19 }
  0x19   : > { %361 = vmatpush.bf16.msra.mxu0 %v544_v4  ;;  %v388_v21 = vmul.f32 %v578_v18, %v387_v20 }
  0x1b   : > { %v389_v22 = vadd.f32 %v578_v18, %v388_v21 }
  0x1c   : > { %541 = vmatmul.msk.bf16.vlgmr.msra.gmra.mxu0 %vm350_vm1, %v317_v5 }
  0x1d   : > { %v391_v23 = vsel %vm390_vm2, %v578_v18, %v389_v22 }
  0x99   : > { %v363_v7 = vpop.f32.mrf.mxu0 }
  0x9a   : > { %v367_v8 = vadd.f32 %v363_v7, %v316_v6 }
  0x9c   : > { %369 = vst.msk [vmem:[#allocation2] sm:$0xff] %vm314_vm0, %v367_v8 }
  0xa1   : > { %v365_v11 = vpop.f32.mrf.mxu0 }
  0xa3   : > { %v373_v13 = vld [vmem:[#allocation2] sm:$0xff] }
  0xa4   : > { %v378_v14 = vadd.f32 %v574_v10, %v373_v13 }
  0xa6   : > { %v381_v15 = vadd.f32 %v380_v12, %v378_v14 }
  0xa8   : > { %v382_v16 = vsel %vm314_vm0, %v381_v15, 0.0 }
  0xa9   : > { %383 = vadd.xlane.f32.xlu0 %v382_v16 }
 0x11c   : > { %v384_v24 = vpop.xlane.xlu0 %383 }
 0x11d   : > { %v392_v25 = vmul.f32 %v391_v23, %v384_v24 }
 0x11f   : > { %v393_v26 = vsub.f32 %v381_v15, %v392_v25 }
 0x121   : > { %v394_v27 = vmul.f32 %v393_v26, %v393_v26 }
 0x123   : > { %v395_v28 = vsel %vm314_vm0, %v394_v27, 0.0 }
 0x124   : > { %396 = vadd.xlane.f32.xlu0 %v395_v28 }
 0x197   : > { %v397_v29 = vpop.xlane.xlu0 %396 }
 0x198   : > { %v398_v30 = vmul.f32 %v397_v29, %v391_v23 }
 0x19a   : > { %v399_v31 = vadd.f32 1e-05, %v398_v30 }
 0x19c   : > { %579 = vrsqrt.f32 %v399_v31  ;;  %vm406_vm4 = vweird.f32 %v399_v31 }
 0x1a2   : > { %v580_v32 = vpop.eup %579 }
 0x1a3   : > { %v401_v33 = vmul.f32 %v580_v32, %v399_v31  ;;  %vm407_vm3 = vweird.f32 %v580_v32 }
 0x1a4   : > { %vm408_vm5 = vmor %vm406_vm4, %vm407_vm3 }
 0x1a5   : > { %v402_v34 = vmul.f32 %v580_v32, %v401_v33 }
 0x1a7   : > { %v403_v35 = vmul.f32 0.5, %v402_v34 }
 0x1a9   : > { %v404_v36 = vsub.f32 1.5, %v403_v35 }
 0x1ab   : > { %v405_v37 = vmul.f32 %v580_v32, %v404_v36 }
 0x1ad   : > { %v409_v39 = vsel %vm408_vm5, %v580_v32, %v405_v37 }
 0x1ae   : > { %v410_v41 = vmul.f32 %v409_v39, %v393_v26 }
 0x1b0   : > { %v415_v42 = vmul.f32 %v575_v38, %v410_v41 }
 0x1b2   : > { %v420_v43 = vadd.f32 %v576_v40, %v415_v42 }
 0x1b4   : > { %v421_v44 = vpack.c.bf16 %v420_v43, %v420_v43 }
 0x1b6   : > { %423 = vst.msk [vmem:[%s308_s27] sm:$0xf] %vm422_vm6, %v421_v44 }
 0x1b7 PF: > { %s16_s23 = sadd.s32 1, %s603_s23   ;;  %s715_s21 = smov %s599_s22 }
 0x1b8   : > { %p13_p5 = scmp.ge.s32.totalorder %s16_s23, 4   ;;  %s716_s22 = smov %s718_s24 }
 0x1ba   :  { %15 = sbr.rel (!%p13_p5) target bundleno = 2 (0x2), region = 88 }

// kernel: transformer_forward.16
= control target key start
LH: loop header
LB: loop body
LE: loop exit
PB: predicated region body
PF: predicated region fallthrough
CT: control target
= control target key end

     0   :  { %s510_s12 = smov 0   ;;  %s512_s13 = smov 0   ;;  %s552_s0 = inlined_call_operand.vmem [shape: bf16[16,32], index: 0, kind: input, shape index: {}]   ;;  %s553_s1 = inlined_call_operand.vmem [shape: bf16[32,64], index: 1, kind: input, shape index: {}]   ;;  %s554_s2 = inlined_call_operand.vmem [shape: f32[1,64], index: 2, kind: input, shape index: {}]   ;;  %s555_s3 = inlined_call_operand.vmem [shape: bf16[16,64], index: 3, kind: output, shape index: {}]  }
   0x1   :  { %s514_s14 = smov 0  }
   0x2 LB: > { %s32_s15 = sadd.s32 1, %s483_s13  ;;  %p423_p0 = scmp.ge.s32.totalorder %s487_s14, 1  ;;  %s487_s14 = sphi %s514_s14, %s13_s14   ;;  %s483_s13 = sphi %s512_s13, %s557_s13   ;;  %s479_s12 = sphi %s510_s12, %s556_s12  }
   0x3   : > { %p34_p1 = scmp.ge.s32.totalorder %s32_s15, 2  ;;  %p186_p2 = scmp.lt.s32.totalorder %s487_s14, 3 }
   0x5   : > { %s559_s15 = smov (%p34_p1, %s32_s15), 0  ;;  %p187_p3 = pnand %p423_p0, %p186_p2 }
   0x6   : > { %p225_p4 = scmp.lt.s32.totalorder (!%p187_p3), %s479_s12, 1 }
   0x7   : > { %190 = sbr.rel (%p187_p3) target bundleno = 163 (0xa3), region = 32 }
   0xc   : > { %v438_v0 = vld [vmem:[%s553_s1 + $0x8] sm:$0xff]  ;;  %vm256_vm0 = vcmask 523264   ;;  %v489_v1 = vmov 0.0   ;;  %v437_v2 = vld [vmem:[%s553_s1] sm:$0xff]  ;;  %s561_s12 = smov (!%p225_p4, %s479_s12), 1  ;;  %vm276_vm1 = vcmask 261120  }
   0xd   : > { %257 = vst.msk [vmem:[#allocation2] sm:$0xff] %vm256_vm0, %v489_v1  ;;  %286 = vmatpush.bf16.msra.mxu0 %v438_v0  ;;  %s424_s20 = sshll.u32 %s561_s12, 2  ;;  %v464_v7 = vld [vmem:[%s554_s2] ss:$0 sm:$0xff]  ;;  %vm307_vm2 = vcmask 519168  }
   0xe   : > { %s231_s23 = scalar_lea.vmem %s552_s0, %s424_s20  ;;  %s250_s28 = scalar_lea.vmem %s555_s3, %s424_s20 }
   0xf   : > { %v259_v3 = vld [vmem:[%s231_s23] sm:$0xf] }
  0x11   : > { %287 = vmatpush.bf16.msra.mxu0 %v437_v2 }
  0x14   : > { %434 = vmatmul.msk.bf16.vlgmr.msra.gmra.mxu0 %vm276_vm1, %v259_v3  ;;  %v258_v4 = vld [vmem:[#allocation2] sm:$0xff] }
  0x91   : > { %v289_v5 = vpop.f32.mrf.mxu0 }
  0x92   : > { %v293_v6 = vadd.f32 %v289_v5, %v258_v4 }
  0x94   : > { %295 = vst.msk [vmem:[#allocation2] sm:$0xff] %vm256_vm0, %v293_v6 }
  0x99   : > { %v291_v8 = vpop.f32.mrf.mxu0 }
  0x9b   : > { %v299_v9 = vld [vmem:[#allocation2] sm:$0xff] }
  0x9c   : > { %v304_v10 = vadd.f32 %v464_v7, %v299_v9 }
  0x9e   : > { %v305_v11 = vmax.f32 %v304_v10, 0.0 }
  0xa0   : > { %v306_v12 = vpack.c.bf16 %v305_v11, %v305_v11 }
  0xa2   : > { %308 = vst.msk [vmem:[%s250_s28] sm:$0xf] %vm307_vm2, %v306_v12 }
  0xa3 PF: > { %s13_s14 = sadd.s32 1, %s487_s14   ;;  %s556_s12 = smov %s483_s13 }
  0xa4   : > { %p10_p5 = scmp.ge.s32.totalorder %s13_s14, 4   ;;  %s557_s13 = smov %s559_s15 }
  0xa6   :  { %12 = sbr.rel (!%p10_p5) target bundleno = 2 (0x2), region = 76 }

// kernel: transformer_forward.23
= control target key start
LH: loop header
LB: loop body
LE: loop exit
PB: predicated region body
PF: predicated region fallthrough
CT: control target
= control target key end

     0   :  { %8 = vsyncpa [#allocation4], 0  ;;  %s712_s0 = inlined_call_operand.vmem [shape: bf16[16,32], index: 0, kind: input, shape index: {}]   ;;  %s713_s1 = inlined_call_operand.vmem [shape: bf16[32,16], index: 1, kind: input, shape index: {}]   ;;  %s714_s2 = inlined_call_operand.vmem [shape: f32[1,16], index: 2, kind: input, shape index: {}]   ;;  %s715_s3 = inlined_call_operand.hbm [shape: f32[16,16], index: 3, kind: output, shape index: {}]  }
   0x1   :  { %10 = vsyncpa [#allocation4 + $0x1], 0  ;;  %s603_s12 = smov 0   ;;  %s605_s13 = smov 0  }
   0x2   :  { %s607_s14 = smov 0   ;;  %s609_s15 = smov 0  }
   0x3   :  { %s611_s16 = smov 0   ;;  %s613_s17 = smov 0  }
   0x4 LB: > { %s421_s18 = sadd.s32 4294967295, %s580_s17   ;;  %s422_s19 = sadd.s32 4294967294, %s580_s17   ;;  %s580_s17 = sphi %s613_s17, %s16_s17   ;;  %s576_s16 = sphi %s611_s16, %s722_s16   ;;  %s572_s15 = sphi %s609_s15, %s721_s15   ;;  %s568_s14 = sphi %s607_s14, %s720_s14   ;;  %s564_s13 = sphi %s605_s13, %s719_s13   ;;  %s560_s12 = sphi %s603_s12, %s718_s12  }
   0x5   : > { %s35_s20 = sadd.s32 1, %s576_s16  ;;  %s126_s21 = sadd.s32 1, %s568_s14 }
   0x6   : > { %p37_p0 = scmp.ge.s32.totalorder %s35_s20, 2  ;;  %p136_p1 = scmp.ne.s32.totalorder %s568_s14, %s564_s13 }
   0x7   : > { %p137_p2 = scmp.eq.s32.totalorder %s421_s18, 1  ;;  %p142_p3 = scmp.ne.s32.totalorder %s564_s13, %s560_s12 }
   0x8   : > { %s724_s20 = smov (%p37_p0, %s35_s20), 0  ;;  %p143_p5 = scmp.eq.s32.totalorder %s422_s19, 1 }
   0x9   : > { %p643_p4 = por %p137_p2, %p136_p1  ;;  %s121_s23 = ssub.s32 %s576_s16, %s724_s20 }
   0xa   : > { %p427_p6 = scmp.ge.s32.totalorder %s580_s17, 1  ;;  %p124_p7 = scmp.eq.s32.totalorder %s121_s23, 0 }
   0xb   : > { %p650_p8 = por %p143_p5, %p142_p3  ;;  %p189_p9 = scmp.lt.s32.totalorder %s580_s17, 3 }
   0xc   : > { %s656_s25 = scalar_select %p124_p7, %s568_s14, %s126_s21  }
   0xd   : > { %p190_p10 = pnand %p427_p6, %p189_p9 }
   0xe   : > { %p226_p11 = scmp.lt.s32.totalorder (!%p190_p10), %s572_s15, 1  ;;  %s223_s8 = sand.u32 (!%p190_p10), 1, %s564_s13  }
   0xf   : > { %193 = sbr.rel (%p190_p10) target bundleno = 169 (0xa9), region = 32  ;;  %s428_s9 = sshll.u32 (!%p190_p10), %s223_s8, 3 }
  0x10   : > { %s440_s10 = sshll.u32 (!%p190_p10), %s572_s15, 3  ;;  %s225_s26 = scalar_lea.vmem (!%p190_p10), [#allocation3], %s428_s9 }
  0x11   : > { %s312_s19 = scalar_lea.hbm (!%p190_p10), %s715_s3, %s440_s10  ;;  %s314_s27 = sshll.u32 (!%p190_p10), %s225_s26, 4  ;;  %s315_s27 = int_to_ptr.vmem [resolvable:$true] %s314_s27 }
  0x12   : > { %s316_s28 = sshll.u32 (!%p190_p10), %s312_s19, 4  ;;  %s522_s6 = scalar_lea.hbm (!%p190_p10), %s715_s3, 16  ;;  %s317_s28 = int_to_ptr.hbm [resolvable:$true] %s316_s28 }
  0x13   : > { %s516_s29 = sshra.s32 (!%p190_p10), %s317_s28, 4  ;;  %s517_s29 = int_to_ptr.hbm [resolvable:$true] %s516_s29 }
  0x14   : > { %v444_v0 = vld [vmem:[%s713_s1 + $0x8] sm:$0xff]  ;;  %vm250_vm0 = vcmask 130048   ;;  %v582_v1 = vmov 0.0   ;;  %v443_v2 = vld [vmem:[%s713_s1] sm:$0xff]  ;;  %s227_s30 = scalar_select %p226_p11, %s572_s15, 1  ;;  %vm270_vm1 = vcmask 261120  }
  0x15   : > { %251 = vst.msk [vmem:[#allocation2] sm:$0xff] %vm250_vm0, %v582_v1  ;;  %280 = vmatpush.bf16.msra.mxu0 %v444_v0  ;;  %v501_v7 = vld [vmem:[%s714_s2] ss:$0 sm:$0xff]  ;;  %s301_s15 = scalar_lea.sflag [#allocation4], %s223_s8  ;;  %p523_p1 = scmp.lt.s32.totalorder %s517_s29, %s715_s3 }
  0x16   : > { %s429_s4 = sshll.u32 %s227_s30, 2  ;;  %s518_s30 = scalar_lea.hbm %s517_s29, 8 }
  0x17   : > { %s232_s7 = scalar_lea.vmem %s712_s0, %s429_s4  ;;  %p519_p12 = scmp.ne.s32.totalorder %s517_s29, %s518_s30 }
  0x18   : > { %v253_v3 = vld [vmem:[%s232_s7] sm:$0xf]  ;;  %p524_p2 = scmp.lt.s32.totalorder %s522_s6, %s518_s30 }
  0x19   : > { %281 = vmatpush.bf16.msra.mxu0 %v443_v2  ;;  %p520_p13 = pnand %p519_p12, %p643_p4 }
  0x1a   : > { %p525_p3 = por %p524_p2, %p523_p1 }
  0x1b   : > { %p521_p0 = pneg %p520_p13 }
  0x1c   : > { %438 = vmatmul.msk.bf16.vlgmr.msra.gmra.mxu0 %vm270_vm1, %v253_v3  ;;  %v252_v4 = vld [vmem:[#allocation2] sm:$0xff] }
  0x1d   : > { %p526_p5 = pnand %p525_p3, %p521_p0 }
  0x99   : > { %v283_v5 = vpop.f32.mrf.mxu0 }
  0x9a   : > { %v287_v6 = vadd.f32 %v283_v5, %v252_v4 }
  0x9c   : > { %289 = vst.msk [vmem:[#allocation2] sm:$0xff] %vm250_vm0, %v287_v6 }
  0xa1   : > { %v285_v8 = vpop.f32.mrf.mxu0 }
  0xa3   : > { %v293_v9 = vld [vmem:[#allocation2] sm:$0xff] }
  0xa4   : > { %v298_v10 = vadd.f32 %v501_v7, %v293_v9 }
  0xa6   : > { %299 = vst.msk [vmem:[%s225_s26] sm:$0xff] %vm250_vm0, %v298_v10 }
  0xa7   : > { %529 = shalt.err (!%p526_p5)
}
  0xa8   : > { %445 = dma.vmem_to_hbm [thread:$0]  (%p643_p4), %s315_s27, 128, %s317_s28, %s301_s15  }
  0xa9 PF: > { %p451_p6 = scmp.ge.s32.totalorder %s580_s17, 2  ;;  %s328_s8 = sand.u32 1, %s560_s12  }
  0xaa   : > { %s329_s10 = scalar_lea.sflag [#allocation4], %s328_s8 }
  0xab   : > { %p448_p7 = pnand %p451_p6, %p650_p8 }
  0xad   : > { %p449_p9 = pneg %p448_p7 }
  0xaf   : > { %555 = dma.done.wait (%p449_p9), %s329_s10, 128  }
  0xb0   : > { %557 = vsyncadd (%p449_p9), %s329_s10, 4294967168  ;;  %s16_s17 = sadd.s32 1, %s580_s17   ;;  %s718_s12 = smov %s564_s13 }
  0xb1   : > { %p13_p10 = scmp.ge.s32.totalorder %s16_s17, 4   ;;  %s719_s13 = smov %s568_s14 }
  0xb2   : > { %s720_s14 = smov %s656_s25  ;;  %s721_s15 = smov %s576_s16 }
  0xb3   : > { %s722_s16 = smov %s724_s20  ;;  %15 = sbr.rel (!%p13_p10) target bundleno = 4 (0x4), region = 81 }
  0xb8   :  { %335 = vsyncpa [#allocation4], 1 }
  0xb9   :  { %337 = vsyncpa [#allocation4 + $0x1], 1 }

</bundles_post_ra>
